<compile_context>
chip_gen: v6e
topology: v6e:2x2x1
jax: 0.10.0
libtpu: 0.0.40
codegen_flags: <defaults>
</compile_context>

<pallas_src>
import jax
import jax.numpy as jnp
from jax.experimental import pallas as pl
from jax.experimental.pallas import tpu as pltpu

K_IN = 784      # 28*28
K_PAD = 896     # 7 * 128  (lane-aligned K for the first matmul)
H = 512         # hidden width
N_OUT = 10      # logits
N_PAD = 128     # lane-dense padded output width


def _round_up(x, m):
    return ((x + m - 1) // m) * m


def _choose_tb(batch):
    """Pick the batch-tile size.

    Prefer 256 (fills the v6e/v7x 256-wide MXU M dimension and amortizes the
    ~0.35 us per-grid-step pipeline overhead) while keeping at least two grid
    steps so dimension_semantics=("parallel",) can shard batch tiles across
    the two TensorCores on v7x.
    """
    if batch >= 512:
        return 256
    if batch >= 256:
        return 128
    if batch >= 16:
        return _round_up(-(-batch // 2), 8)   # small batch: two tiles
    return max(8, _round_up(batch, 8))        # tiny batch: one padded tile


def mlp_kernel(x_ref, w1_ref, b1_ref, w2_ref, b2_ref, w3_ref, b3_ref, o_ref):
    # x_ref:  (TB, 896)  bf16
    # w1_ref: (896, 512) bf16   b1_ref: (1, 512) f32
    # w2_ref: (512, 512) bf16   b2_ref: (1, 512) f32
    # w3_ref: (512, 128) bf16   b3_ref: (1, 128) f32
    # o_ref:  (TB, 128)  f32
    x = x_ref[...]
    # Layer 1: bf16 MXU inputs, f32 accumulation; bias add + ReLU in f32.
    h1 = jnp.dot(x, w1_ref[...], preferred_element_type=jnp.float32) + b1_ref[...]
    h1 = jnp.maximum(h1, 0.0)
    # Layer 2
    h2 = jnp.dot(h1.astype(jnp.bfloat16), w2_ref[...],
                 preferred_element_type=jnp.float32) + b2_ref[...]
    h2 = jnp.maximum(h2, 0.0)
    # Layer 3 (padded to 128 output lanes; extra columns are exactly zero)
    logits = jnp.dot(h2.astype(jnp.bfloat16), w3_ref[...],
                     preferred_element_type=jnp.float32) + b3_ref[...]
    o_ref[...] = logits.astype(o_ref.dtype)


def prepare_params(params):
    """One-time padding/casting of the weights (hoisted out of the hot path).

    params: (w1, b1, w2, b2, w3, b3) in (in, out) / (1, out) layout, float32,
            unpadded: (784,512)/(1,512)/(512,512)/(1,512)/(512,10)/(1,10).
    Returns bf16 weights padded to lane-dense shapes plus f32 bias rows.
    """
    w1, b1, w2, b2, w3, b3 = params
    w1_p = (jnp.zeros((K_PAD, H), jnp.float32).at[:K_IN, :].set(w1)
            .astype(jnp.bfloat16))
    w2_p = w2.astype(jnp.bfloat16)
    w3_p = (jnp.zeros((H, N_PAD), jnp.float32).at[:, :N_OUT].set(w3)
            .astype(jnp.bfloat16))
    b3_p = jnp.zeros((1, N_PAD), jnp.float32).at[:, :N_OUT].set(b3)
    return (w1_p, b1.reshape(1, H).astype(jnp.float32),
            w2_p, b2.reshape(1, H).astype(jnp.float32),
            w3_p, b3_p)


def neural_network_forward(x_nchw, prepared_params):
    """x_nchw: (B, 1, 28, 28) float32 (NCHW, like the PyTorch module's input).

    prepared_params: output of prepare_params() (padded bf16 weights, f32 biases).
    """
    w1_p, b1, w2_p, b2, w3_p, b3_p = prepared_params
    batch = x_nchw.shape[0]

    # nn.Flatten(): keep batch dim, flatten the rest -> (B, 784).
    # Cast to bf16 BEFORE padding: one bf16 pad instead of padded-f32 + cast.
    x_flat = x_nchw.reshape(batch, -1).astype(jnp.bfloat16)
    tb = _choose_tb(batch)
    b_pad = _round_up(batch, tb)
    x_bf = jnp.pad(x_flat, ((0, b_pad - batch), (0, K_PAD - K_IN)))

    num_tiles = b_pad // tb
    const = lambda i: (0, 0)   # resident weights: same block every step (one DMA)

    flops = 2 * b_pad * (K_PAD * H + H * H + H * N_PAD)
    bytes_accessed = (
        b_pad * K_PAD * 2                        # x (bf16)
        + (K_PAD * H + H * H + H * N_PAD) * 2    # weights (bf16)
        + (H + H + N_PAD) * 4                    # biases (f32)
        + b_pad * N_PAD * 4                      # output (f32)
    )

    out_padded = pl.pallas_call(
        mlp_kernel,
        out_shape=jax.ShapeDtypeStruct((b_pad, N_PAD), jnp.float32),
        grid_spec=pltpu.PrefetchScalarGridSpec(
            num_scalar_prefetch=0,
            grid=(num_tiles,),
            in_specs=[
                pl.BlockSpec((tb, K_PAD), lambda i: (i, 0)),   # x tile (pipelined)
                pl.BlockSpec((K_PAD, H), const),               # w1 (resident)
                pl.BlockSpec((1, H), const),                   # b1
                pl.BlockSpec((H, H), const),                   # w2
                pl.BlockSpec((1, H), const),                   # b2
                pl.BlockSpec((H, N_PAD), const),               # w3 (padded N)
                pl.BlockSpec((1, N_PAD), const),               # b3 (padded N)
            ],
            out_specs=pl.BlockSpec((tb, N_PAD), lambda i: (i, 0)),
        ),
        compiler_params=pltpu.CompilerParams(
            dimension_semantics=("parallel",),     # batch tiles across TCs (v7x)
            vmem_limit_bytes=32 * 1024 * 1024,     # usage is only ~3-6 MiB
        ),
        cost_estimate=pl.CostEstimate(
            flops=flops, transcendentals=0, bytes_accessed=bytes_accessed),
    )(x_bf, w1_p, b1, w2_p, b2, w3_p, b3_p)

    # Strip batch and lane padding in plain JAX.
    return out_padded[:batch, :N_OUT]


def init_params(key):
    """Deterministic parameter init with the same shapes as the PyTorch module.

    PyTorch nn.Linear stores weight as (out, in); we build (in, out) directly
    for the kernel's (batch, in) @ (in, out) layout. Biases are (1, out) rows.
    """
    k1, k2, k3, k4, k5, k6 = jax.random.split(key, 6)
    scale1 = 1.0 / jnp.sqrt(784.0)
    scale2 = 1.0 / jnp.sqrt(512.0)
    w1 = jax.random.uniform(k1, (K_IN, H), jnp.float32, -scale1, scale1)
    b1 = jax.random.uniform(k2, (1, H), jnp.float32, -scale1, scale1)
    w2 = jax.random.uniform(k3, (H, H), jnp.float32, -scale2, scale2)
    b2 = jax.random.uniform(k4, (1, H), jnp.float32, -scale2, scale2)
    w3 = jax.random.uniform(k5, (H, N_OUT), jnp.float32, -scale2, scale2)
    b3 = jax.random.uniform(k6, (1, N_OUT), jnp.float32, -scale2, scale2)
    return w1, b1, w2, b2, w3, b3


if __name__ == "__main__":
    key = jax.random.PRNGKey(0)
    pkey, xkey, xkey2 = jax.random.split(key, 3)

    params = init_params(pkey)
    prepared = jax.block_until_ready(prepare_params(params))   # one-time pad/cast

    fwd = jax.jit(neural_network_forward)

    w1, b1, w2, b2, w3, b3 = params

    def bf(a):
        return a.astype(jnp.bfloat16).astype(jnp.float32)

    def ref_bf16(xf):   # emulate bf16-input / f32-accumulate matmuls
        r = jnp.maximum(bf(xf) @ bf(w1) + b1, 0.0)
        r = jnp.maximum(bf(r) @ bf(w2) + b2, 0.0)
        return bf(r) @ bf(w3) + b3

    def ref_f32(xf):    # full-f32 PyTorch-equivalent forward
        r = jnp.maximum(xf @ w1 + b1, 0.0)
        r = jnp.maximum(r @ w2 + b2, 0.0)
        return r @ w3 + b3

    # Small MNIST-shaped demo batch (NCHW): single-tile path.
    x_small = jax.random.normal(xkey, (8, 1, 28, 28), dtype=jnp.float32)
    logits_small = jax.block_until_ready(fwd(x_small, prepared))
    assert logits_small.shape == (8, 10)
    xf_small = x_small.reshape(8, -1)
    assert jnp.allclose(logits_small, ref_bf16(xf_small), atol=2e-3, rtol=2e-3)
    assert jnp.allclose(logits_small, ref_f32(xf_small), atol=5e-2, rtol=5e-2)

    # Larger batch: exercises the TB=256, multi-step, batch-padded path.
    x_big = jax.random.normal(xkey2, (520, 1, 28, 28), dtype=jnp.float32)
    logits_big = jax.block_until_ready(fwd(x_big, prepared))
    assert logits_big.shape == (520, 10)
    assert jnp.allclose(logits_big, ref_f32(x_big.reshape(520, -1)),
                        atol=5e-2, rtol=5e-2)

    print("KERNEL_OK")
</pallas_src>

<mosaic_0001>
module attributes {stable_mosaic.version = 11 : i64} {
  func.func @mlp_kernel(%arg0: i32, %arg1: memref<8x896xbf16, #tpu.memory_space<vmem>>, %arg2: memref<896x512xbf16, #tpu.memory_space<vmem>>, %arg3: memref<1x512xf32, #tpu.memory_space<vmem>>, %arg4: memref<512x512xbf16, #tpu.memory_space<vmem>>, %arg5: memref<1x512xf32, #tpu.memory_space<vmem>>, %arg6: memref<512x128xbf16, #tpu.memory_space<vmem>>, %arg7: memref<1x128xf32, #tpu.memory_space<vmem>>, %arg8: memref<8x128xf32, #tpu.memory_space<vmem>>) attributes {dimension_semantics = [#tpu.dimension_semantics<parallel>], iteration_bounds = array<i64: 1>, scalar_prefetch = 0 : i64, scratch_operands = 0 : i64, tpu.core_type = #tpu.core_type<tc>, window_params = [{transform_indices = @transform_0, window_bounds = array<i64: 8, 896>}, {pipeline_mode = #tpu.pipeline_mode<synchronous>, transform_indices = @transform_1, window_bounds = array<i64: 896, 512>}, {pipeline_mode = #tpu.pipeline_mode<synchronous>, transform_indices = @transform_2, window_bounds = array<i64: 1, 512>}, {pipeline_mode = #tpu.pipeline_mode<synchronous>, transform_indices = @transform_3, window_bounds = array<i64: 512, 512>}, {pipeline_mode = #tpu.pipeline_mode<synchronous>, transform_indices = @transform_4, window_bounds = array<i64: 1, 512>}, {pipeline_mode = #tpu.pipeline_mode<synchronous>, transform_indices = @transform_5, window_bounds = array<i64: 512, 128>}, {pipeline_mode = #tpu.pipeline_mode<synchronous>, transform_indices = @transform_6, window_bounds = array<i64: 1, 128>}, {transform_indices = @transform_7, window_bounds = array<i64: 8, 128>}]} {
    %c0 = arith.constant 0 : index
    %c0_0 = arith.constant 0 : index
    %0 = vector.load %arg1[%c0, %c0_0] : memref<8x896xbf16, #tpu.memory_space<vmem>>, vector<8x896xbf16>
    %c0_1 = arith.constant 0 : index
    %c0_2 = arith.constant 0 : index
    %1 = vector.load %arg2[%c0_1, %c0_2] : memref<896x512xbf16, #tpu.memory_space<vmem>>, vector<896x512xbf16>
    %cst = arith.constant dense<0.000000e+00> : vector<8x512xf32>
    %2 = tpu.matmul %0, %1, %cst {dimension_numbers = #tpu.dot_dimension_numbers<[1], [0], [0], [1], [0, 0, 1, 1], [], []>} : vector<8x896xbf16>, vector<896x512xbf16>, vector<8x512xf32> -> vector<8x512xf32>
    %c0_3 = arith.constant 0 : index
    %c0_4 = arith.constant 0 : index
    %3 = vector.load %arg3[%c0_3, %c0_4] : memref<1x512xf32, #tpu.memory_space<vmem>>, vector<1x512xf32>
    %4 = vector.broadcast %3 : vector<1x512xf32> to vector<8x512xf32>
    %5 = arith.addf %2, %4 : vector<8x512xf32>
    %cst_5 = arith.constant 0.000000e+00 : f32
    %6 = vector.broadcast %cst_5 : f32 to vector<8x512xf32>
    %7 = arith.maximumf %5, %6 : vector<8x512xf32>
    %8 = arith.truncf %7 : vector<8x512xf32> to vector<8x512xbf16>
    %c0_6 = arith.constant 0 : index
    %c0_7 = arith.constant 0 : index
    %9 = vector.load %arg4[%c0_6, %c0_7] : memref<512x512xbf16, #tpu.memory_space<vmem>>, vector<512x512xbf16>
    %cst_8 = arith.constant dense<0.000000e+00> : vector<8x512xf32>
    %10 = tpu.matmul %8, %9, %cst_8 {dimension_numbers = #tpu.dot_dimension_numbers<[1], [0], [0], [1], [0, 0, 1, 1], [], []>} : vector<8x512xbf16>, vector<512x512xbf16>, vector<8x512xf32> -> vector<8x512xf32>
    %c0_9 = arith.constant 0 : index
    %c0_10 = arith.constant 0 : index
    %11 = vector.load %arg5[%c0_9, %c0_10] : memref<1x512xf32, #tpu.memory_space<vmem>>, vector<1x512xf32>
    %12 = vector.broadcast %11 : vector<1x512xf32> to vector<8x512xf32>
    %13 = arith.addf %10, %12 : vector<8x512xf32>
    %cst_11 = arith.constant 0.000000e+00 : f32
    %14 = vector.broadcast %cst_11 : f32 to vector<8x512xf32>
    %15 = arith.maximumf %13, %14 : vector<8x512xf32>
    %16 = arith.truncf %15 : vector<8x512xf32> to vector<8x512xbf16>
    %c0_12 = arith.constant 0 : index
    %c0_13 = arith.constant 0 : index
    %17 = vector.load %arg6[%c0_12, %c0_13] : memref<512x128xbf16, #tpu.memory_space<vmem>>, vector<512x128xbf16>
    %cst_14 = arith.constant dense<0.000000e+00> : vector<8x128xf32>
    %18 = tpu.matmul %16, %17, %cst_14 {dimension_numbers = #tpu.dot_dimension_numbers<[1], [0], [0], [1], [0, 0, 1, 1], [], []>} : vector<8x512xbf16>, vector<512x128xbf16>, vector<8x128xf32> -> vector<8x128xf32>
    %c0_15 = arith.constant 0 : index
    %c0_16 = arith.constant 0 : index
    %19 = vector.load %arg7[%c0_15, %c0_16] : memref<1x128xf32, #tpu.memory_space<vmem>>, vector<1x128xf32>
    %20 = vector.broadcast %19 : vector<1x128xf32> to vector<8x128xf32>
    %21 = arith.addf %18, %20 : vector<8x128xf32>
    %c0_17 = arith.constant 0 : index
    %c0_18 = arith.constant 0 : index
    %22 = vector.load %arg8[%c0_17, %c0_18] : memref<8x128xf32, #tpu.memory_space<vmem>>, vector<8x128xf32>
    tpu.vector_store %arg8[%c0_17, %c0_18], %21 {strides = array<i32>} : memref<8x128xf32, #tpu.memory_space<vmem>>, vector<8x128xf32>,
    return
  }
  func.func @transform_0(%arg0: i32) -> (i32, i32) {
    %c0_i32 = arith.constant 0 : i32
    %c0_i32_0 = arith.constant 0 : i32
    return %arg0, %c0_i32 : i32, i32
  }
  func.func @transform_1(%arg0: i32) -> (i32, i32) {
    %c0_i32 = arith.constant 0 : i32
    %c0_i32_0 = arith.constant 0 : i32
    %c0_i32_1 = arith.constant 0 : i32
    return %c0_i32, %c0_i32_0 : i32, i32
  }
  func.func @transform_2(%arg0: i32) -> (i32, i32) {
    %c0_i32 = arith.constant 0 : i32
    %c0_i32_0 = arith.constant 0 : i32
    %c0_i32_1 = arith.constant 0 : i32
    return %c0_i32, %c0_i32_0 : i32, i32
  }
  func.func @transform_3(%arg0: i32) -> (i32, i32) {
    %c0_i32 = arith.constant 0 : i32
    %c0_i32_0 = arith.constant 0 : i32
    %c0_i32_1 = arith.constant 0 : i32
    return %c0_i32, %c0_i32_0 : i32, i32
  }
  func.func @transform_4(%arg0: i32) -> (i32, i32) {
    %c0_i32 = arith.constant 0 : i32
    %c0_i32_0 = arith.constant 0 : i32
    %c0_i32_1 = arith.constant 0 : i32
    return %c0_i32, %c0_i32_0 : i32, i32
  }
  func.func @transform_5(%arg0: i32) -> (i32, i32) {
    %c0_i32 = arith.constant 0 : i32
    %c0_i32_0 = arith.constant 0 : i32
    %c0_i32_1 = arith.constant 0 : i32
    return %c0_i32, %c0_i32_0 : i32, i32
  }
  func.func @transform_6(%arg0: i32) -> (i32, i32) {
    %c0_i32 = arith.constant 0 : i32
    %c0_i32_0 = arith.constant 0 : i32
    %c0_i32_1 = arith.constant 0 : i32
    return %c0_i32, %c0_i32_0 : i32, i32
  }
  func.func @transform_7(%arg0: i32) -> (i32, i32) {
    %c0_i32 = arith.constant 0 : i32
    %c0_i32_0 = arith.constant 0 : i32
    return %arg0, %c0_i32 : i32, i32
  }
}

</mosaic_0001>

<bundles_post_ra>
// kernel: neural_network_forward.1
= control target key start
LH: loop header
LB: loop body
LE: loop exit
PB: predicated region body
PF: predicated region fallthrough
CT: control target
= control target key end

     0   :  { %12 = vsyncpa [#allocation3], 0  ;;  %s4440_s0 = inlined_call_operand.vmem [shape: bf16[8,896], index: 0, kind: input, shape index: {}]   ;;  %s4441_s1 = inlined_call_operand.hbm [shape: bf16[896,512], index: 1, kind: input, shape index: {}]   ;;  %s4442_s2 = inlined_call_operand.vmem [shape: f32[1,512], index: 2, kind: input, shape index: {}]   ;;  %s4443_s3 = inlined_call_operand.hbm [shape: bf16[512,512], index: 3, kind: input, shape index: {}]   ;;  %s4444_s4 = inlined_call_operand.vmem [shape: f32[1,512], index: 4, kind: input, shape index: {}]   ;;  %s4445_s5 = inlined_call_operand.vmem [shape: bf16[512,128], index: 5, kind: input, shape index: {}]   ;;  %s4446_s6 = inlined_call_operand.vmem [shape: f32[1,128], index: 6, kind: input, shape index: {}]   ;;  %s4447_s7 = inlined_call_operand.hbm [shape: f32[8,128], index: 7, kind: output, shape index: {}]  }
   0x1   :  { %13 = vsyncpa [#allocation6], 0 }
   0x2   :  { %14 = vsyncpa [#allocation4], 0  ;;  %s4185_s24 = smov [#allocation2]  }
   0x3   :  { %s22_s25 = sshll.u32 %s4185_s24, 4  ;;  %s23_s25 = int_to_ptr.vmem [resolvable:$true] %s22_s25 }
   0x4   :  { %s4127_s26 = scalar_lea.vmem %s23_s25, 28672  ;;  %p4132_p1 = scmp.lt.s32.totalorder %s23_s25, %s23_s25 }
   0x5   :  { %p4128_p0 = scmp.ne.s32.totalorder %s23_s25, %s4127_s26  ;;  %p4133_p2 = scmp.lt.s32.totalorder %s4127_s26, %s4127_s26 }
   0x7   :  { %p4134_p3 = por %p4133_p2, %p4132_p1 }
   0x9   :  { %p4135_p4 = pnand %p4134_p3, %p4128_p0 }
   0xb   :  { %4138 = shalt.err (!%p4135_p4)
}
   0xc   :  { %s4186_s27 = smov 256   ;;  %s4187_s28 = smov 16  }
   0xd   :  { %28 = dma.hbm_to_vmem [thread:$0]  %s4441_s1, 28672, %s23_s25, [#allocation3], %s4186_s27, %s4186_s27, %s4187_s28  }
   0xe   :  { %s4188_s8 = smov [#allocation5]  }
   0xf   :  { %s36_s9 = sshll.u32 %s4188_s8, 4  ;;  %s37_s9 = int_to_ptr.vmem [resolvable:$true] %s36_s9 }
  0x10   :  { %s4147_s10 = scalar_lea.vmem %s37_s9, 16384  ;;  %p4152_p6 = scmp.lt.s32.totalorder %s37_s9, %s37_s9 }
  0x11   :  { %p4148_p5 = scmp.ne.s32.totalorder %s37_s9, %s4147_s10  ;;  %p4153_p7 = scmp.lt.s32.totalorder %s4147_s10, %s4147_s10 }
  0x13   :  { %p4154_p8 = por %p4153_p7, %p4152_p6 }
  0x15   :  { %p4155_p9 = pnand %p4154_p8, %p4148_p5 }
  0x17   :  { %4158 = shalt.err (!%p4155_p9)
}
  0x18   :  { %42 = dma.hbm_to_vmem [thread:$0]  %s4443_s3, 16384, %s37_s9, [#allocation6], %s4186_s27, %s4186_s27, %s4187_s28  }
  0x19   :  { %4179 = dma.done.wait [#allocation3], 28672  }
  0x1a   :  { %4180 = vsyncadd [#allocation3], 4294938624 }
  0x1b   :  { %4181 = dma.done.wait [#allocation6], 16384  }
  0x1c   :  { %4182 = vsyncadd [#allocation6], 4294950912  ;;  %v3551_v0 = vld [vmem:[#allocation2 + $0xe4] ss:$16 sps:$4 sm:$0xff]   ;;  %v3555_v2 = vld [vmem:[#allocation2 + $0xe0] ss:$16 sps:$4 sm:$0xff]  }
  0x1d   :  { %v3553_v1 = vld [vmem:[#allocation2 + $0x2e4] ss:$16 sps:$4 sm:$0xff]   ;;  %1451 = vmatprep.subr.bf16.mxu0 %v3551_v0  ;;  %v3556_v3 = vld [vmem:[#allocation2 + $0x2e0] ss:$16 sps:$4 sm:$0xff]   ;;  %v57_v48 = vld [vmem:[%s4440_s0 + $0x8] sm:$0xff]  ;;  %s4190_s10 = smov [#allocation7]  }
  0x1e   :  { %1492 = vmatprep.subr.bf16.mxu1 %v3553_v1  ;;  %v3557_v4 = vld [vmem:[#allocation2 + $0xc4] ss:$16 sps:$4 sm:$0xff]   ;;  %1452 = vmatpush1.bf16.msra.mxu0 %v3555_v2  ;;  %v3561_v6 = vld [vmem:[#allocation2 + $0xc0] ss:$16 sps:$4 sm:$0xff]   ;;  %v4245_v51 = vcombine.high %v57_v48, %v57_v48  ;;  %s3099_s11 = sshll.u32 %s4190_s10, 4  ;;  %s3100_s11 = int_to_ptr.vmem [resolvable:$true] %s3099_s11 }
  0x1f   :  { %1493 = vmatpush1.bf16.msra.mxu1 %v3556_v3  ;;  %v3559_v5 = vld [vmem:[#allocation2 + $0x2c4] ss:$16 sps:$4 sm:$0xff]   ;;  %1453 = vmatprep.subr.bf16.mxu0 %v3557_v4  ;;  %v3562_v7 = vld [vmem:[#allocation2 + $0x2c0] ss:$16 sps:$4 sm:$0xff]   ;;  %s4159_s12 = scalar_lea.vmem %s3100_s11, 128  ;;  %p4164_p11 = scmp.lt.s32.totalorder %s3100_s11, %s3100_s11 }
  0x20   :  { %1494 = vmatprep.subr.bf16.mxu1 %v3559_v5  ;;  %v3563_v8 = vld [vmem:[#allocation2 + $0xa4] ss:$16 sps:$4 sm:$0xff]   ;;  %v3567_v10 = vld [vmem:[#allocation2 + $0xa0] ss:$16 sps:$4 sm:$0xff]   ;;  %1524 = vmatprep.mubr.bf16.mxu1 %v4245_v51  ;;  %p4160_p10 = scmp.ne.s32.totalorder %s3100_s11, %s4159_s12  ;;  %p4165_p12 = scmp.lt.s32.totalorder %s4159_s12, %s4159_s12 }
  0x21   :  { %v3565_v9 = vld [vmem:[#allocation2 + $0x2a4] ss:$16 sps:$4 sm:$0xff]   ;;  %v3568_v11 = vld [vmem:[#allocation2 + $0x2a0] ss:$16 sps:$4 sm:$0xff]  }
  0x22   :  { %1454 = vmatpush1.bf16.msra.mxu0 %v3561_v6  ;;  %v3569_v12 = vld [vmem:[#allocation2 + $0x84] ss:$16 sps:$4 sm:$0xff]   ;;  %v3573_v14 = vld [vmem:[#allocation2 + $0x80] ss:$16 sps:$4 sm:$0xff]   ;;  %p4166_p13 = por %p4165_p12, %p4164_p11 }
  0x23   :  { %1495 = vmatpush1.bf16.msra.mxu1 %v3562_v7  ;;  %1455 = vmatprep.subr.bf16.mxu0 %v3563_v8  ;;  %v3571_v13 = vld [vmem:[#allocation2 + $0x284] ss:$16 sps:$4 sm:$0xff]   ;;  %v3574_v15 = vld [vmem:[#allocation2 + $0x280] ss:$16 sps:$4 sm:$0xff]   ;;  %v4251_v7 = vcombine.low %v57_v48, %v57_v48  ;;  %v3711_v48 = vld [vmem:[#allocation2 + $0xcc] ss:$16 sps:$4 sm:$0xff]  }
  0x24   :  { %1496 = vmatprep.subr.bf16.mxu1 %v3565_v9  ;;  %v3575_v16 = vld [vmem:[#allocation2 + $0x64] ss:$16 sps:$4 sm:$0xff]   ;;  %v3579_v18 = vld [vmem:[#allocation2 + $0x60] ss:$16 sps:$4 sm:$0xff]   ;;  %p4167_p0 = pnand %p4166_p13, %p4160_p10 }
  0x25   :  { %v3577_v17 = vld [vmem:[#allocation2 + $0x264] ss:$16 sps:$4 sm:$0xff]   ;;  %v3580_v19 = vld [vmem:[#allocation2 + $0x260] ss:$16 sps:$4 sm:$0xff]  }
  0x26   :  { %1456 = vmatpush1.bf16.msra.mxu0 %v3567_v10  ;;  %v3581_v20 = vld [vmem:[#allocation2 + $0x44] ss:$16 sps:$4 sm:$0xff]   ;;  %v3585_v22 = vld [vmem:[#allocation2 + $0x40] ss:$16 sps:$4 sm:$0xff]  }
  0x27   :  { %1497 = vmatpush1.bf16.msra.mxu1 %v3568_v11  ;;  %1457 = vmatprep.subr.bf16.mxu0 %v3569_v12  ;;  %v3583_v21 = vld [vmem:[#allocation2 + $0x244] ss:$16 sps:$4 sm:$0xff]   ;;  %v3586_v23 = vld [vmem:[#allocation2 + $0x240] ss:$16 sps:$4 sm:$0xff]  }
  0x28   :  { %1498 = vmatprep.subr.bf16.mxu1 %v3571_v13  ;;  %v3587_v24 = vld [vmem:[#allocation2 + $0x24] ss:$16 sps:$4 sm:$0xff]   ;;  %v3591_v26 = vld [vmem:[#allocation2 + $0x20] ss:$16 sps:$4 sm:$0xff]  }
  0x29   :  { %v3589_v25 = vld [vmem:[#allocation2 + $0x224] ss:$16 sps:$4 sm:$0xff]   ;;  %v3592_v27 = vld [vmem:[#allocation2 + $0x220] ss:$16 sps:$4 sm:$0xff]  }
  0x2a   :  { %1458 = vmatpush1.bf16.msra.mxu0 %v3573_v14  ;;  %v3593_v28 = vld [vmem:[#allocation2 + $0x4] ss:$16 sps:$4 sm:$0xff]   ;;  %v3597_v30 = vld [vmem:[#allocation2] ss:$16 sps:$4 sm:$0xff]  }
  0x2b   :  { %1499 = vmatpush1.bf16.msra.mxu1 %v3574_v15  ;;  %1459 = vmatprep.subr.bf16.mxu0 %v3575_v16  ;;  %v3595_v29 = vld [vmem:[#allocation2 + $0x204] ss:$16 sps:$4 sm:$0xff]   ;;  %v3598_v31 = vld [vmem:[#allocation2 + $0x200] ss:$16 sps:$4 sm:$0xff]   ;;  %v4189_v16 = vmov 0  }
  0x2c   :  { %1500 = vmatprep.subr.bf16.mxu1 %v3577_v17  ;;  %v3599_v32 = vld [vmem:[#allocation2 + $0x1e4] ss:$16 sps:$4 sm:$0xff]   ;;  %v3603_v34 = vld [vmem:[#allocation2 + $0x1e0] ss:$16 sps:$4 sm:$0xff]  }
  0x2d   :  { %v3601_v33 = vld [vmem:[#allocation2 + $0x3e4] ss:$16 sps:$4 sm:$0xff]   ;;  %v3604_v35 = vld [vmem:[#allocation2 + $0x3e0] ss:$16 sps:$4 sm:$0xff]  }
  0x2e   :  { %1460 = vmatpush1.bf16.msra.mxu0 %v3579_v18  ;;  %v3605_v36 = vld [vmem:[#allocation2 + $0x1c4] ss:$16 sps:$4 sm:$0xff]   ;;  %v3609_v38 = vld [vmem:[#allocation2 + $0x1c0] ss:$16 sps:$4 sm:$0xff]  }
  0x2f   :  { %1501 = vmatpush1.bf16.msra.mxu1 %v3580_v19  ;;  %1461 = vmatprep.subr.bf16.mxu0 %v3581_v20  ;;  %v3607_v37 = vld [vmem:[#allocation2 + $0x3c4] ss:$16 sps:$4 sm:$0xff]   ;;  %v3610_v39 = vld [vmem:[#allocation2 + $0x3c0] ss:$16 sps:$4 sm:$0xff]  }
  0x30   :  { %1502 = vmatprep.subr.bf16.mxu1 %v3583_v21  ;;  %v3611_v40 = vld [vmem:[#allocation2 + $0x1a4] ss:$16 sps:$4 sm:$0xff]   ;;  %v3615_v42 = vld [vmem:[#allocation2 + $0x1a0] ss:$16 sps:$4 sm:$0xff]  }
  0x31   :  { %v3613_v41 = vld [vmem:[#allocation2 + $0x3a4] ss:$16 sps:$4 sm:$0xff]   ;;  %v3616_v43 = vld [vmem:[#allocation2 + $0x3a0] ss:$16 sps:$4 sm:$0xff]  }
  0x32   :  { %1462 = vmatpush1.bf16.msra.mxu0 %v3585_v22  ;;  %v3617_v44 = vld [vmem:[#allocation2 + $0x184] ss:$16 sps:$4 sm:$0xff]   ;;  %v3621_v49 = vld [vmem:[#allocation2 + $0x180] ss:$16 sps:$4 sm:$0xff]  }
  0x33   :  { %1503 = vmatpush1.bf16.msra.mxu1 %v3586_v23  ;;  %1463 = vmatprep.subr.bf16.mxu0 %v3587_v24  ;;  %v3619_v45 = vld [vmem:[#allocation2 + $0x384] ss:$16 sps:$4 sm:$0xff]   ;;  %v3622_v50 = vld [vmem:[#allocation2 + $0x380] ss:$16 sps:$4 sm:$0xff]  }
  0x34   :  { %1504 = vmatprep.subr.bf16.mxu1 %v3589_v25  ;;  %v56_v46 = vld [vmem:[%s4440_s0] sm:$0xff] }
  0x35   :  { %v4240_v47 = vcombine.high %v56_v46, %v56_v46  ;;  %v3623_v52 = vld [vmem:[#allocation2 + $0x164] ss:$16 sps:$4 sm:$0xff]   ;;  %v3627_v54 = vld [vmem:[#allocation2 + $0x160] ss:$16 sps:$4 sm:$0xff]   ;;  %v4249_v6 = vcombine.low %v56_v46, %v56_v46 }
  0x36   :  { %1464 = vmatpush1.bf16.msra.mxu0 %v3591_v26  ;;  %v3625_v53 = vld [vmem:[#allocation2 + $0x364] ss:$16 sps:$4 sm:$0xff]   ;;  %v3628_v55 = vld [vmem:[#allocation2 + $0x360] ss:$16 sps:$4 sm:$0xff]  }
  0x37   :  { %1505 = vmatpush1.bf16.msra.mxu1 %v3592_v27  ;;  %1465 = vmatprep.subr.bf16.mxu0 %v3593_v28  ;;  %v3629_v56 = vld [vmem:[#allocation2 + $0x144] ss:$16 sps:$4 sm:$0xff]   ;;  %v3633_v58 = vld [vmem:[#allocation2 + $0x140] ss:$16 sps:$4 sm:$0xff]  }
  0x38   :  { %1506 = vmatprep.subr.bf16.mxu1 %v3595_v29  ;;  %1483 = vmatprep.mubr.bf16.mxu0 %v4240_v47  ;;  %v3631_v57 = vld [vmem:[#allocation2 + $0x344] ss:$16 sps:$4 sm:$0xff]   ;;  %v3634_v59 = vld [vmem:[#allocation2 + $0x340] ss:$16 sps:$4 sm:$0xff]  }
  0x39   :  { %v3635_v60 = vld [vmem:[#allocation2 + $0x124] ss:$16 sps:$4 sm:$0xff]   ;;  %v3639_v62 = vld [vmem:[#allocation2 + $0x120] ss:$16 sps:$4 sm:$0xff]  }
  0x3a   :  { %1466 = vmatpush1.bf16.msra.mxu0 %v3597_v30  ;;  %v3637_v61 = vld [vmem:[#allocation2 + $0x324] ss:$16 sps:$4 sm:$0xff]   ;;  %v3640_v63 = vld [vmem:[#allocation2 + $0x320] ss:$16 sps:$4 sm:$0xff]  }
  0x3b   :  { %1507 = vmatpush1.bf16.msra.mxu1 %v3598_v31  ;;  %1467 = vmatprep.subr.bf16.mxu0 %v3599_v32  ;;  %v3641_v0 = vld [vmem:[#allocation2 + $0x104] ss:$16 sps:$4 sm:$0xff]   ;;  %v3645_v2 = vld [vmem:[#allocation2 + $0x100] ss:$16 sps:$4 sm:$0xff]  }
  0x3c   :  { %1508 = vmatprep.subr.bf16.mxu1 %v3601_v33  ;;  %v3643_v1 = vld [vmem:[#allocation2 + $0x304] ss:$16 sps:$4 sm:$0xff]   ;;  %v3646_v3 = vld [vmem:[#allocation2 + $0x300] ss:$16 sps:$4 sm:$0xff]  }
  0x3d   :  { %v3653_v4 = vld [vmem:[#allocation2 + $0x4e4] ss:$16 sps:$4 sm:$0xff]   ;;  %v3651_v8 = vld [vmem:[#allocation2 + $0x4e0] ss:$16 sps:$4 sm:$0xff]  }
  0x3e   :  { %1468 = vmatpush2.bf16.msra.mxu0 %v3603_v34  ;;  %v3656_v5 = vld [vmem:[#allocation2 + $0x6e4] ss:$16 sps:$4 sm:$0xff]   ;;  %v3654_v9 = vld [vmem:[#allocation2 + $0x6e0] ss:$16 sps:$4 sm:$0xff]  }
  0x3f   :  { %1509 = vmatpush2.bf16.msra.mxu1 %v3604_v35  ;;  %1469 = vmatprep.subr.bf16.mxu0 %v3605_v36  ;;  %v3659_v10 = vld [vmem:[#allocation2 + $0x4c4] ss:$16 sps:$4 sm:$0xff]   ;;  %v3657_v12 = vld [vmem:[#allocation2 + $0x4c0] ss:$16 sps:$4 sm:$0xff]  }
  0x40   :  { %1510 = vmatprep.subr.bf16.mxu1 %v3607_v37  ;;  %v3662_v11 = vld [vmem:[#allocation2 + $0x6c4] ss:$16 sps:$4 sm:$0xff]   ;;  %v3660_v13 = vld [vmem:[#allocation2 + $0x6c0] ss:$16 sps:$4 sm:$0xff]  }
  0x41   :  { %v3665_v14 = vld [vmem:[#allocation2 + $0x4a4] ss:$16 sps:$4 sm:$0xff]   ;;  %v3663_v17 = vld [vmem:[#allocation2 + $0x4a0] ss:$16 sps:$4 sm:$0xff]  }
  0x42   :  { %1470 = vmatpush2.bf16.msra.mxu0 %v3609_v38  ;;  %v3668_v15 = vld [vmem:[#allocation2 + $0x6a4] ss:$16 sps:$4 sm:$0xff]   ;;  %v3666_v18 = vld [vmem:[#allocation2 + $0x6a0] ss:$16 sps:$4 sm:$0xff]  }
  0x43   :  { %1511 = vmatpush2.bf16.msra.mxu1 %v3610_v39  ;;  %1471 = vmatprep.subr.bf16.mxu0 %v3611_v40  ;;  %v3671_v19 = vld [vmem:[#allocation2 + $0x484] ss:$16 sps:$4 sm:$0xff]   ;;  %v3669_v21 = vld [vmem:[#allocation2 + $0x480] ss:$16 sps:$4 sm:$0xff]  }
  0x44   :  { %1512 = vmatprep.subr.bf16.mxu1 %v3613_v41  ;;  %v3674_v20 = vld [vmem:[#allocation2 + $0x684] ss:$16 sps:$4 sm:$0xff]   ;;  %v3672_v22 = vld [vmem:[#allocation2 + $0x680] ss:$16 sps:$4 sm:$0xff]  }
  0x45   :  { %v3677_v23 = vld [vmem:[#allocation2 + $0x464] ss:$16 sps:$4 sm:$0xff]   ;;  %v3675_v25 = vld [vmem:[#allocation2 + $0x460] ss:$16 sps:$4 sm:$0xff]  }
  0x46   :  { %1472 = vmatpush2.bf16.msra.mxu0 %v3615_v42  ;;  %v3680_v24 = vld [vmem:[#allocation2 + $0x664] ss:$16 sps:$4 sm:$0xff]   ;;  %v3678_v26 = vld [vmem:[#allocation2 + $0x660] ss:$16 sps:$4 sm:$0xff]   ;;  %v3705_v42 = vld [vmem:[#allocation2 + $0xec] ss:$16 sps:$4 sm:$0xff]  }
  0x47   :  { %1513 = vmatpush2.bf16.msra.mxu1 %v3616_v43  ;;  %1473 = vmatprep.subr.bf16.mxu0 %v3617_v44  ;;  %v3683_v27 = vld [vmem:[#allocation2 + $0x444] ss:$16 sps:$4 sm:$0xff]   ;;  %v3681_v29 = vld [vmem:[#allocation2 + $0x440] ss:$16 sps:$4 sm:$0xff]   ;;  %v3702_v44 = vld [vmem:[%s4440_s0 + $0x18] ss:$0 sps:$4 sm:$0xff]  }
  0x48   :  { %1514 = vmatprep.subr.bf16.mxu1 %v3619_v45  ;;  %v3686_v28 = vld [vmem:[#allocation2 + $0x644] ss:$16 sps:$4 sm:$0xff]   ;;  %v3684_v30 = vld [vmem:[#allocation2 + $0x640] ss:$16 sps:$4 sm:$0xff]   ;;  %v3703_v45 = vld [vmem:[#allocation2 + $0xe8] ss:$16 sps:$4 sm:$0xff]  }
  0x49   :  { %v3689_v31 = vld [vmem:[#allocation2 + $0x424] ss:$16 sps:$4 sm:$0xff]   ;;  %v3687_v34 = vld [vmem:[#allocation2 + $0x420] ss:$16 sps:$4 sm:$0xff]  }
  0x4a   :  { %1474 = vmatpush2.bf16.msra.mxu0 %v3621_v49  ;;  %v3692_v32 = vld [vmem:[#allocation2 + $0x624] ss:$16 sps:$4 sm:$0xff]   ;;  %v3690_v36 = vld [vmem:[#allocation2 + $0x620] ss:$16 sps:$4 sm:$0xff]  }
  0x4b   :  { %1515 = vmatpush2.bf16.msra.mxu1 %v3622_v50  ;;  %1475 = vmatprep.subr.bf16.mxu0 %v3623_v52  ;;  %v4259_v33 = vld [vmem:[%s4440_s0 + $0x10] sm:$0xff]  ;;  %v3709_v50 = vld [vmem:[#allocation2 + $0xc8] ss:$16 sps:$4 sm:$0xff]  }
  0x4c   :  { %1516 = vmatprep.subr.bf16.mxu1 %v3625_v53  ;;  %v4263_v35 = vcombine.high %v4259_v33, %v4259_v33  ;;  %v3695_v37 = vld [vmem:[#allocation2 + $0x404] ss:$16 sps:$4 sm:$0xff]   ;;  %v3693_v39 = vld [vmem:[#allocation2 + $0x400] ss:$16 sps:$4 sm:$0xff]   ;;  %v3717_v53 = vld [vmem:[#allocation2 + $0xac] ss:$16 sps:$4 sm:$0xff]  }
  0x4d   :  { %v3698_v38 = vld [vmem:[#allocation2 + $0x604] ss:$16 sps:$4 sm:$0xff]   ;;  %v3696_v40 = vld [vmem:[#allocation2 + $0x600] ss:$16 sps:$4 sm:$0xff]  }
  0x4e   :  { %1476 = vmatpush2.bf16.msra.mxu0 %v3627_v54  ;;  %v3701_v41 = vld [vmem:[#allocation2 + $0x5e4] ss:$16 sps:$4 sm:$0xff]   ;;  %v3699_v43 = vld [vmem:[#allocation2 + $0x5e0] ss:$16 sps:$4 sm:$0xff]  }
  0x4f   :  { %1517 = vmatpush2.bf16.msra.mxu1 %v3628_v55  ;;  %1477 = vmatprep.subr.bf16.mxu0 %v3629_v56  ;;  %v3708_v46 = vld [vmem:[#allocation2 + $0x5c4] ss:$16 sps:$4 sm:$0xff]   ;;  %v3706_v49 = vld [vmem:[#allocation2 + $0x5c0] ss:$16 sps:$4 sm:$0xff]   ;;  %v3715_v55 = vld [vmem:[#allocation2 + $0xa8] ss:$16 sps:$4 sm:$0xff]  }
  0x50   :  { %1518 = vmatprep.subr.bf16.mxu1 %v3631_v57  ;;  %v3714_v52 = vld [vmem:[#allocation2 + $0x5a4] ss:$16 sps:$4 sm:$0xff]   ;;  %v3712_v54 = vld [vmem:[#allocation2 + $0x5a0] ss:$16 sps:$4 sm:$0xff]   ;;  %v3723_v57 = vld [vmem:[#allocation2 + $0x8c] ss:$16 sps:$4 sm:$0xff]  }
  0x51   :  { %v3720_v56 = vld [vmem:[#allocation2 + $0x584] ss:$16 sps:$4 sm:$0xff]  }
  0x52   :  { %1478 = vmatpush2.bf16.msra.mxu0 %v3633_v58  ;;  %v3718_v58 = vld [vmem:[#allocation2 + $0x580] ss:$16 sps:$4 sm:$0xff]  }
  0x53   :  { %1519 = vmatpush2.bf16.msra.mxu1 %v3634_v59  ;;  %1479 = vmatprep.subr.bf16.mxu0 %v3635_v60  ;;  %v3721_v59 = vld [vmem:[#allocation2 + $0x88] ss:$16 sps:$4 sm:$0xff]   ;;  %v3726_v60 = vld [vmem:[#allocation2 + $0x564] ss:$16 sps:$4 sm:$0xff]  }
  0x54   :  { %1520 = vmatprep.subr.bf16.mxu1 %v3637_v61  ;;  %v3729_v61 = vld [vmem:[#allocation2 + $0x6c] ss:$16 sps:$4 sm:$0xff]  }
  0x56   :  { %1480 = vmatpush2.bf16.msra.mxu0 %v3639_v62  ;;  %v3724_v62 = vld [vmem:[#allocation2 + $0x560] ss:$16 sps:$4 sm:$0xff]  }
  0x57   :  { %1521 = vmatpush2.bf16.msra.mxu1 %v3640_v63  ;;  %1481 = vmatprep.subr.bf16.mxu0 %v3641_v0  ;;  %v3732_v63 = vld [vmem:[#allocation2 + $0x544] ss:$16 sps:$4 sm:$0xff]   ;;  %v3735_v0 = vld [vmem:[#allocation2 + $0x4c] ss:$16 sps:$4 sm:$0xff]  }
  0x58   :  { %1522 = vmatprep.subr.bf16.mxu1 %v3643_v1  ;;  %v3730_v1 = vld [vmem:[#allocation2 + $0x540] ss:$16 sps:$4 sm:$0xff]  }
  0x5a   :  { %1482 = vmatpush2.bf16.msra.mxu0 %v3645_v2  ;;  %v3733_v2 = vld [vmem:[#allocation2 + $0x48] ss:$16 sps:$4 sm:$0xff]  }
  0x5b   :  { %1523 = vmatpush2.bf16.msra.mxu1 %v3646_v3  ;;  %1533 = vmatprep.subr.bf16.mxu0 %v3653_v4  ;;  %v3738_v3 = vld [vmem:[#allocation2 + $0x524] ss:$16 sps:$4 sm:$0xff]   ;;  %v3741_v4 = vld [vmem:[#allocation2 + $0x2c] ss:$16 sps:$4 sm:$0xff]  }
  0x5c   :  { %1574 = vmatprep.subr.bf16.mxu1 %v3656_v5  ;;  %v3736_v5 = vld [vmem:[#allocation2 + $0x520] ss:$16 sps:$4 sm:$0xff]  }
  0x5d   :  { %1484 = vmatmul.mubr.bf16.vlgmr.msra.gmra.mxu0 %v4249_v6 }
  0x5e   :  { %1525 = vmatmul.mubr.bf16.vlgmr.msra.gmra.mxu1 %v4251_v7  ;;  %1534 = vmatpush1.bf16.msra.mxu0 %v3651_v8  ;;  %v3739_v8 = vld [vmem:[#allocation2 + $0x28] ss:$16 sps:$4 sm:$0xff]  }
  0x5f   :  { %1575 = vmatpush1.bf16.msra.mxu1 %v3654_v9  ;;  %1535 = vmatprep.subr.bf16.mxu0 %v3659_v10  ;;  %v3744_v9 = vld [vmem:[#allocation2 + $0x504] ss:$16 sps:$4 sm:$0xff]   ;;  %v3747_v10 = vld [vmem:[#allocation2 + $0xc] ss:$16 sps:$4 sm:$0xff]  }
  0x60   :  { %1576 = vmatprep.subr.bf16.mxu1 %v3662_v11  ;;  %1606 = vmatprep.mubr.bf16.mxu1 %v4189_v16  ;;  %v3742_v11 = vld [vmem:[#allocation2 + $0x500] ss:$16 sps:$4 sm:$0xff]  }
  0x61   :  { %1565 = vmatprep.mubr.bf16.mxu0 %v4263_v35 }
  0x62   :  { %1536 = vmatpush1.bf16.msra.mxu0 %v3657_v12  ;;  %v3745_v12 = vld [vmem:[#allocation2 + $0x8] ss:$16 sps:$4 sm:$0xff]  }
  0x63   :  { %1577 = vmatpush1.bf16.msra.mxu1 %v3660_v13  ;;  %1537 = vmatprep.subr.bf16.mxu0 %v3665_v14  ;;  %v3752_v13 = vld [vmem:[#allocation2 + $0x1ec] ss:$16 sps:$4 sm:$0xff]  }
  0x64   :  { %1578 = vmatprep.subr.bf16.mxu1 %v3668_v15  ;;  %v3755_v14 = vld [vmem:[#allocation2 + $0x2ec] ss:$16 sps:$4 sm:$0xff]   ;;  %v4272_v15 = vcombine.low %v4259_v33, %v4259_v33  ;;  %v3774_v33 = vld [vmem:[#allocation2 + $0x168] ss:$16 sps:$4 sm:$0xff]  }
  0x66   :  { %1538 = vmatpush1.bf16.msra.mxu0 %v3663_v17  ;;  %v3750_v17 = vld [vmem:[#allocation2 + $0x1e8] ss:$16 sps:$4 sm:$0xff]  }
  0x67   :  { %1579 = vmatpush1.bf16.msra.mxu1 %v3666_v18  ;;  %1539 = vmatprep.subr.bf16.mxu0 %v3671_v19  ;;  %v3753_v18 = vld [vmem:[#allocation2 + $0x2e8] ss:$16 sps:$4 sm:$0xff]   ;;  %v3758_v19 = vld [vmem:[#allocation2 + $0x1cc] ss:$16 sps:$4 sm:$0xff]  }
  0x68   :  { %1580 = vmatprep.subr.bf16.mxu1 %v3674_v20  ;;  %v3761_v20 = vld [vmem:[#allocation2 + $0x2cc] ss:$16 sps:$4 sm:$0xff]  }
  0x6a   :  { %1540 = vmatpush1.bf16.msra.mxu0 %v3669_v21  ;;  %v3756_v21 = vld [vmem:[#allocation2 + $0x1c8] ss:$16 sps:$4 sm:$0xff]  }
  0x6b   :  { %1581 = vmatpush1.bf16.msra.mxu1 %v3672_v22  ;;  %1541 = vmatprep.subr.bf16.mxu0 %v3677_v23  ;;  %v3759_v22 = vld [vmem:[#allocation2 + $0x2c8] ss:$16 sps:$4 sm:$0xff]   ;;  %v3764_v23 = vld [vmem:[#allocation2 + $0x1ac] ss:$16 sps:$4 sm:$0xff]  }
  0x6c   :  { %1582 = vmatprep.subr.bf16.mxu1 %v3680_v24  ;;  %v3767_v24 = vld [vmem:[#allocation2 + $0x2ac] ss:$16 sps:$4 sm:$0xff]  }
  0x6e   :  { %1542 = vmatpush1.bf16.msra.mxu0 %v3675_v25  ;;  %v3762_v25 = vld [vmem:[#allocation2 + $0x1a8] ss:$16 sps:$4 sm:$0xff]  }
  0x6f   :  { %1583 = vmatpush1.bf16.msra.mxu1 %v3678_v26  ;;  %1543 = vmatprep.subr.bf16.mxu0 %v3683_v27  ;;  %v3765_v26 = vld [vmem:[#allocation2 + $0x2a8] ss:$16 sps:$4 sm:$0xff]   ;;  %v3770_v27 = vld [vmem:[#allocation2 + $0x18c] ss:$16 sps:$4 sm:$0xff]  }
  0x70   :  { %1584 = vmatprep.subr.bf16.mxu1 %v3686_v28  ;;  %v3773_v28 = vld [vmem:[#allocation2 + $0x28c] ss:$16 sps:$4 sm:$0xff]  }
  0x72   :  { %1544 = vmatpush1.bf16.msra.mxu0 %v3681_v29  ;;  %v3768_v29 = vld [vmem:[#allocation2 + $0x188] ss:$16 sps:$4 sm:$0xff]  }
  0x73   :  { %1585 = vmatpush1.bf16.msra.mxu1 %v3684_v30  ;;  %1545 = vmatprep.subr.bf16.mxu0 %v3689_v31  ;;  %v3771_v30 = vld [vmem:[#allocation2 + $0x288] ss:$16 sps:$4 sm:$0xff]   ;;  %v3776_v31 = vld [vmem:[#allocation2 + $0x16c] ss:$16 sps:$4 sm:$0xff]  }
  0x74   :  { %1586 = vmatprep.subr.bf16.mxu1 %v3692_v32  ;;  %v3779_v32 = vld [vmem:[#allocation2 + $0x26c] ss:$16 sps:$4 sm:$0xff]  }
  0x76   :  { %1546 = vmatpush1.bf16.msra.mxu0 %v3687_v34  ;;  %v3782_v34 = vld [vmem:[#allocation2 + $0x14c] ss:$16 sps:$4 sm:$0xff]  }
  0x77   :  { %1587 = vmatpush1.bf16.msra.mxu1 %v3690_v36  ;;  %1547 = vmatprep.subr.bf16.mxu0 %v3695_v37  ;;  %v3785_v36 = vld [vmem:[#allocation2 + $0x24c] ss:$16 sps:$4 sm:$0xff]   ;;  %v3780_v37 = vld [vmem:[#allocation2 + $0x148] ss:$16 sps:$4 sm:$0xff]  }
  0x78   :  { %1588 = vmatprep.subr.bf16.mxu1 %v3698_v38  ;;  %v3783_v38 = vld [vmem:[#allocation2 + $0x248] ss:$16 sps:$4 sm:$0xff]  }
  0x7a   :  { %1548 = vmatpush1.bf16.msra.mxu0 %v3693_v39  ;;  %v3788_v39 = vld [vmem:[#allocation2 + $0x12c] ss:$16 sps:$4 sm:$0xff]  }
  0x7b   :  { %1589 = vmatpush1.bf16.msra.mxu1 %v3696_v40  ;;  %1549 = vmatprep.subr.bf16.mxu0 %v3701_v41  ;;  %v3791_v40 = vld [vmem:[#allocation2 + $0x22c] ss:$16 sps:$4 sm:$0xff]   ;;  %v3786_v41 = vld [vmem:[#allocation2 + $0x128] ss:$16 sps:$4 sm:$0xff]  }
  0x7c   :  { %1615 = vmatprep.subr.bf16.mxu1 %v3705_v42  ;;  %v3789_v42 = vld [vmem:[#allocation2 + $0x228] ss:$16 sps:$4 sm:$0xff]  }
  0x7e   :  { %1607 = vmatmul.mubr.bf16.vlgmr.msra.gmra.mxu1 %v3702_v44  ;;  %1550 = vmatpush2.bf16.msra.mxu0 %v3699_v43  ;;  %v3794_v43 = vld [vmem:[#allocation2 + $0x10c] ss:$16 sps:$4 sm:$0xff]  }
  0x7f   :  { %1616 = vmatpush1.bf16.msra.mxu1 %v3703_v45  ;;  %1551 = vmatprep.subr.bf16.mxu0 %v3708_v46  ;;  %v3797_v44 = vld [vmem:[#allocation2 + $0x20c] ss:$16 sps:$4 sm:$0xff]   ;;  %v3792_v45 = vld [vmem:[#allocation2 + $0x108] ss:$16 sps:$4 sm:$0xff]  }
  0x80   :  { %1617 = vmatprep.subr.bf16.mxu1 %v3711_v48  ;;  %1647 = vmatprep.mubr.bf16.mxu1 %v4240_v47  ;;  %v3727_v47 = vld [vmem:[#allocation2 + $0x68] ss:$16 sps:$4 sm:$0xff]   ;;  %v3800_v48 = vld [vmem:[#allocation2 + $0x3ec] ss:$16 sps:$4 sm:$0xff]  }
  0x81   :  { %v3795_v46 = vld [vmem:[#allocation2 + $0x208] ss:$16 sps:$4 sm:$0xff]  }
  0x82   :  { %1552 = vmatpush2.bf16.msra.mxu0 %v3706_v49  ;;  %v3803_v49 = vld [vmem:[#allocation2 + $0x4ec] ss:$16 sps:$4 sm:$0xff]  }
  0x83   :  { %1618 = vmatpush1.bf16.msra.mxu1 %v3709_v50  ;;  %1553 = vmatprep.subr.bf16.mxu0 %v3714_v52  ;;  %v3798_v50 = vld [vmem:[#allocation2 + $0x3e8] ss:$16 sps:$4 sm:$0xff]  }
  0x84   :  { %1619 = vmatprep.subr.bf16.mxu1 %v3717_v53  ;;  %v3801_v52 = vld [vmem:[#allocation2 + $0x4e8] ss:$16 sps:$4 sm:$0xff]   ;;  %v3806_v53 = vld [vmem:[#allocation2 + $0x3cc] ss:$16 sps:$4 sm:$0xff]  }
  0x86   :  { %1554 = vmatpush2.bf16.msra.mxu0 %v3712_v54  ;;  %v3809_v54 = vld [vmem:[#allocation2 + $0x4cc] ss:$16 sps:$4 sm:$0xff]  }
  0x87   :  { %1620 = vmatpush1.bf16.msra.mxu1 %v3715_v55  ;;  %1555 = vmatprep.subr.bf16.mxu0 %v3720_v56  ;;  %v3804_v55 = vld [vmem:[#allocation2 + $0x3c8] ss:$16 sps:$4 sm:$0xff]  }
  0x88   :  { %1621 = vmatprep.subr.bf16.mxu1 %v3723_v57  ;;  %v3807_v56 = vld [vmem:[#allocation2 + $0x4c8] ss:$16 sps:$4 sm:$0xff]   ;;  %v3812_v57 = vld [vmem:[#allocation2 + $0x3ac] ss:$16 sps:$4 sm:$0xff]  }
  0x8a   :  { %1556 = vmatpush2.bf16.msra.mxu0 %v3718_v58  ;;  %v3815_v58 = vld [vmem:[#allocation2 + $0x4ac] ss:$16 sps:$4 sm:$0xff]  }
  0x8b   :  { %1622 = vmatpush1.bf16.msra.mxu1 %v3721_v59  ;;  %1557 = vmatprep.subr.bf16.mxu0 %v3726_v60  ;;  %v3810_v59 = vld [vmem:[#allocation2 + $0x3a8] ss:$16 sps:$4 sm:$0xff]  }
  0x8c   :  { %1623 = vmatprep.subr.bf16.mxu1 %v3729_v61  ;;  %v3813_v60 = vld [vmem:[#allocation2 + $0x4a8] ss:$16 sps:$4 sm:$0xff]   ;;  %v3818_v61 = vld [vmem:[#allocation2 + $0x38c] ss:$16 sps:$4 sm:$0xff]  }
  0x8e   :  { %1558 = vmatpush2.bf16.msra.mxu0 %v3724_v62  ;;  %v3821_v62 = vld [vmem:[#allocation2 + $0x48c] ss:$16 sps:$4 sm:$0xff]  }
  0x8f   :  { %1624 = vmatpush1.bf16.msra.mxu1 %v3727_v47  ;;  %1559 = vmatprep.subr.bf16.mxu0 %v3732_v63  ;;  %v3816_v47 = vld [vmem:[#allocation2 + $0x388] ss:$16 sps:$4 sm:$0xff]   ;;  %v3824_v63 = vld [vmem:[#allocation2 + $0x36c] ss:$16 sps:$4 sm:$0xff]  }
  0x90   :  { %1625 = vmatprep.subr.bf16.mxu1 %v3735_v0  ;;  %v3827_v0 = vld [vmem:[#allocation2 + $0x46c] ss:$16 sps:$4 sm:$0xff]  }
  0x92   :  { %1560 = vmatpush2.bf16.msra.mxu0 %v3730_v1  ;;  %v3822_v1 = vld [vmem:[#allocation2 + $0x368] ss:$16 sps:$4 sm:$0xff]  }
  0x93   :  { %1626 = vmatpush1.bf16.msra.mxu1 %v3733_v2  ;;  %1561 = vmatprep.subr.bf16.mxu0 %v3738_v3  ;;  %v3825_v2 = vld [vmem:[#allocation2 + $0x468] ss:$16 sps:$4 sm:$0xff]   ;;  %v3830_v3 = vld [vmem:[#allocation2 + $0x34c] ss:$16 sps:$4 sm:$0xff]  }
  0x94   :  { %1627 = vmatprep.subr.bf16.mxu1 %v3741_v4  ;;  %v3833_v4 = vld [vmem:[#allocation2 + $0x44c] ss:$16 sps:$4 sm:$0xff]  }
  0x96   :  { %1562 = vmatpush2.bf16.msra.mxu0 %v3736_v5  ;;  %v3831_v5 = vld [vmem:[#allocation2 + $0x448] ss:$16 sps:$4 sm:$0xff]  }
  0x97   :  { %1628 = vmatpush1.bf16.msra.mxu1 %v3739_v8  ;;  %1563 = vmatprep.subr.bf16.mxu0 %v3744_v9  ;;  %v3836_v8 = vld [vmem:[#allocation2 + $0x32c] ss:$16 sps:$4 sm:$0xff]  }
  0x98   :  { %1629 = vmatprep.subr.bf16.mxu1 %v3747_v10  ;;  %v3839_v9 = vld [vmem:[#allocation2 + $0x42c] ss:$16 sps:$4 sm:$0xff]   ;;  %v3834_v10 = vld [vmem:[#allocation2 + $0x328] ss:$16 sps:$4 sm:$0xff]  }
  0x9a   :  { %1564 = vmatpush2.bf16.msra.mxu0 %v3742_v11  ;;  %v3837_v11 = vld [vmem:[#allocation2 + $0x428] ss:$16 sps:$4 sm:$0xff]  }
  0x9b   :  { %1630 = vmatpush1.bf16.msra.mxu1 %v3745_v12  ;;  %1656 = vmatprep.subr.bf16.mxu0 %v3755_v14  ;;  %v3842_v12 = vld [vmem:[#allocation2 + $0x30c] ss:$16 sps:$4 sm:$0xff]   ;;  %v3840_v14 = vld [vmem:[#allocation2 + $0x308] ss:$16 sps:$4 sm:$0xff]  }
  0x9c   :  { %1631 = vmatprep.subr.bf16.mxu1 %v3752_v13  ;;  %v3845_v13 = vld [vmem:[#allocation2 + $0x40c] ss:$16 sps:$4 sm:$0xff]  }
  0x9d   :  { %1566 = vmatmul.mubr.bf16.vlgmr.msra.gmra.mxu0 %v4272_v15 }
  0x9e   :  { %1657 = vmatpush1.bf16.msra.mxu0 %v3753_v18  ;;  %1688 = vmatprep.mubr.bf16.mxu0 %v4245_v51  ;;  %v3777_v51 = vld [vmem:[#allocation2 + $0x268] ss:$16 sps:$4 sm:$0xff]   ;;  %v3848_v18 = vld [vmem:[#allocation2 + $0x5ec] ss:$16 sps:$4 sm:$0xff]  }
  0x9f   :  { %1632 = vmatpush2.bf16.msra.mxu1 %v3750_v17  ;;  %1658 = vmatprep.subr.bf16.mxu0 %v3761_v20  ;;  %v3843_v17 = vld [vmem:[#allocation2 + $0x408] ss:$16 sps:$4 sm:$0xff]  }
  0xa0   :  { %1633 = vmatprep.subr.bf16.mxu1 %v3758_v19  ;;  %v3851_v19 = vld [vmem:[#allocation2 + $0x6ec] ss:$16 sps:$4 sm:$0xff]   ;;  %v3846_v20 = vld [vmem:[#allocation2 + $0x5e8] ss:$16 sps:$4 sm:$0xff]  }
  0xa2   :  { %1659 = vmatpush1.bf16.msra.mxu0 %v3759_v22  ;;  %v3854_v22 = vld [vmem:[#allocation2 + $0x5cc] ss:$16 sps:$4 sm:$0xff]  }
  0xa3   :  { %1634 = vmatpush2.bf16.msra.mxu1 %v3756_v21  ;;  %1660 = vmatprep.subr.bf16.mxu0 %v3767_v24  ;;  %v3849_v21 = vld [vmem:[#allocation2 + $0x6e8] ss:$16 sps:$4 sm:$0xff]  }
  0xa4   :  { %1635 = vmatprep.subr.bf16.mxu1 %v3764_v23  ;;  %v3857_v23 = vld [vmem:[#allocation2 + $0x6cc] ss:$16 sps:$4 sm:$0xff]   ;;  %v3852_v24 = vld [vmem:[#allocation2 + $0x5c8] ss:$16 sps:$4 sm:$0xff]  }
  0xa6   :  { %1661 = vmatpush1.bf16.msra.mxu0 %v3765_v26  ;;  %v3860_v26 = vld [vmem:[#allocation2 + $0x5ac] ss:$16 sps:$4 sm:$0xff]  }
  0xa7   :  { %1636 = vmatpush2.bf16.msra.mxu1 %v3762_v25  ;;  %1662 = vmatprep.subr.bf16.mxu0 %v3773_v28  ;;  %v3855_v25 = vld [vmem:[#allocation2 + $0x6c8] ss:$16 sps:$4 sm:$0xff]  }
  0xa8   :  { %1637 = vmatprep.subr.bf16.mxu1 %v3770_v27  ;;  %v3863_v27 = vld [vmem:[#allocation2 + $0x6ac] ss:$16 sps:$4 sm:$0xff]   ;;  %v3858_v28 = vld [vmem:[#allocation2 + $0x5a8] ss:$16 sps:$4 sm:$0xff]  }
  0xaa   :  { %1663 = vmatpush1.bf16.msra.mxu0 %v3771_v30  ;;  %v3866_v30 = vld [vmem:[#allocation2 + $0x58c] ss:$16 sps:$4 sm:$0xff]  }
  0xab   :  { %1638 = vmatpush2.bf16.msra.mxu1 %v3768_v29  ;;  %1664 = vmatprep.subr.bf16.mxu0 %v3779_v32  ;;  %v3861_v29 = vld [vmem:[#allocation2 + $0x6a8] ss:$16 sps:$4 sm:$0xff]  }
  0xac   :  { %1639 = vmatprep.subr.bf16.mxu1 %v3776_v31  ;;  %v3869_v31 = vld [vmem:[#allocation2 + $0x68c] ss:$16 sps:$4 sm:$0xff]   ;;  %v3864_v32 = vld [vmem:[#allocation2 + $0x588] ss:$16 sps:$4 sm:$0xff]  }
  0xae   :  { %1665 = vmatpush1.bf16.msra.mxu0 %v3777_v51  ;;  %v3875_v51 = vld [vmem:[#allocation2 + $0x66c] ss:$16 sps:$4 sm:$0xff]  }
  0xaf   :  { %1640 = vmatpush2.bf16.msra.mxu1 %v3774_v33  ;;  %1666 = vmatprep.subr.bf16.mxu0 %v3785_v36  ;;  %v3867_v33 = vld [vmem:[#allocation2 + $0x688] ss:$16 sps:$4 sm:$0xff]  }
  0xb0   :  { %1641 = vmatprep.subr.bf16.mxu1 %v3782_v34  ;;  %v3870_v34 = vld [vmem:[#allocation2 + $0x568] ss:$16 sps:$4 sm:$0xff]  }
  0xb1   :  { %v3873_v36 = vld [vmem:[#allocation2 + $0x668] ss:$16 sps:$4 sm:$0xff]  }
  0xb2   :  { %1667 = vmatpush1.bf16.msra.mxu0 %v3783_v38  ;;  %v3876_v38 = vld [vmem:[#allocation2 + $0x548] ss:$16 sps:$4 sm:$0xff]  }
  0xb3   :  { %1642 = vmatpush2.bf16.msra.mxu1 %v3780_v37  ;;  %1668 = vmatprep.subr.bf16.mxu0 %v3791_v40  ;;  %v3878_v37 = vld [vmem:[#allocation2 + $0x54c] ss:$16 sps:$4 sm:$0xff]  }
  0xb4   :  { %1643 = vmatprep.subr.bf16.mxu1 %v3788_v39  ;;  %v3879_v39 = vld [vmem:[#allocation2 + $0x648] ss:$16 sps:$4 sm:$0xff]   ;;  %v3884_v40 = vld [vmem:[#allocation2 + $0x52c] ss:$16 sps:$4 sm:$0xff]  }
  0xb6   :  { %1669 = vmatpush1.bf16.msra.mxu0 %v3789_v42  ;;  %v3882_v42 = vld [vmem:[#allocation2 + $0x528] ss:$16 sps:$4 sm:$0xff]  }
  0xb7   :  { %1644 = vmatpush2.bf16.msra.mxu1 %v3786_v41  ;;  %1670 = vmatprep.subr.bf16.mxu0 %v3797_v44  ;;  %v3887_v41 = vld [vmem:[#allocation2 + $0x62c] ss:$16 sps:$4 sm:$0xff]  }
  0xb8   :  { %1645 = vmatprep.subr.bf16.mxu1 %v3794_v43  ;;  %v3885_v43 = vld [vmem:[#allocation2 + $0x628] ss:$16 sps:$4 sm:$0xff]   ;;  %v3890_v44 = vld [vmem:[#allocation2 + $0x50c] ss:$16 sps:$4 sm:$0xff]  }
  0xba   :  { %1671 = vmatpush1.bf16.msra.mxu0 %v3795_v46  ;;  %v3888_v46 = vld [vmem:[#allocation2 + $0x508] ss:$16 sps:$4 sm:$0xff]  }
  0xbb   :  { %1646 = vmatpush2.bf16.msra.mxu1 %v3792_v45  ;;  %1672 = vmatprep.subr.bf16.mxu0 %v3800_v48  ;;  %v3893_v45 = vld [vmem:[#allocation2 + $0x60c] ss:$16 sps:$4 sm:$0xff]   ;;  %v3891_v48 = vld [vmem:[#allocation2 + $0x608] ss:$16 sps:$4 sm:$0xff]  }
  0xbc   :  { %1697 = vmatprep.subr.bf16.mxu1 %v3803_v49  ;;  %v3896_v49 = vld [vmem:[#allocation5 + $0xe4] ss:$16 sps:$4 sm:$0xff]  }
  0xbe   :  { %1648 = vmatmul.mubr.bf16.vlgmr.msra.gmra.mxu1 %v4249_v6  ;;  %1673 = vmatpush2.bf16.msra.mxu0 %v3798_v50  ;;  %v3819_v6 = vld [vmem:[#allocation2 + $0x488] ss:$16 sps:$4 sm:$0xff]   ;;  %v3894_v50 = vld [vmem:[#allocation5 + $0xe0] ss:$16 sps:$4 sm:$0xff]  }
  0xbf   :  { %1698 = vmatpush1.bf16.msra.mxu1 %v3801_v52  ;;  %1674 = vmatprep.subr.bf16.mxu0 %v3806_v53  ;;  %v3899_v52 = vld [vmem:[#allocation5 + $0xc4] ss:$16 sps:$4 sm:$0xff]   ;;  %v4118_v53 = vld [vmem:[%s4440_s0 + $0x18] ss:$0 sps:$4 sm:$0xff]  }
  0xc0   :  { %1699 = vmatprep.subr.bf16.mxu1 %v3809_v54  ;;  %1729 = vmatprep.mubr.bf16.mxu1 %v4263_v35  ;;  %v3828_v35 = vld [vmem:[#allocation2 + $0x348] ss:$16 sps:$4 sm:$0xff]   ;;  %v3897_v54 = vld [vmem:[#allocation5 + $0xc0] ss:$16 sps:$4 sm:$0xff]  }
  0xc2   :  { %1675 = vmatpush2.bf16.msra.mxu0 %v3804_v55  ;;  %v3902_v55 = vld [vmem:[#allocation5 + $0xa4] ss:$16 sps:$4 sm:$0xff]  }
  0xc3   :  { %1700 = vmatpush1.bf16.msra.mxu1 %v3807_v56  ;;  %1676 = vmatprep.subr.bf16.mxu0 %v3812_v57  ;;  %v3900_v56 = vld [vmem:[#allocation5 + $0xa0] ss:$16 sps:$4 sm:$0xff]   ;;  %v3905_v57 = vld [vmem:[#allocation5 + $0x84] ss:$16 sps:$4 sm:$0xff]  }
  0xc4   :  { %1701 = vmatprep.subr.bf16.mxu1 %v3815_v58  ;;  %v3903_v58 = vld [vmem:[#allocation5 + $0x80] ss:$16 sps:$4 sm:$0xff]  }
  0xc6   :  { %1677 = vmatpush2.bf16.msra.mxu0 %v3810_v59  ;;  %v3966_v59 = vld [vmem:[#allocation5 + $0x2e0] ss:$16 sps:$4 sm:$0xff]  }
  0xc7   :  { %1702 = vmatpush1.bf16.msra.mxu1 %v3813_v60  ;;  %1678 = vmatprep.subr.bf16.mxu0 %v3818_v61  ;;  %v3968_v60 = vld [vmem:[#allocation5 + $0x2e4] ss:$16 sps:$4 sm:$0xff]  }
  0xc8   :  { %1703 = vmatprep.subr.bf16.mxu1 %v3821_v62  ;;  %v3908_v61 = vld [vmem:[#allocation5 + $0x64] ss:$16 sps:$4 sm:$0xff]   ;;  %v3972_v62 = vld [vmem:[#allocation5 + $0x2c0] ss:$16 sps:$4 sm:$0xff]  }
  0xca   :  { %1679 = vmatpush2.bf16.msra.mxu0 %v3816_v47  ;;  %v3974_v47 = vld [vmem:[#allocation5 + $0x2c4] ss:$16 sps:$4 sm:$0xff]  }
  0xcb   :  { %1704 = vmatpush1.bf16.msra.mxu1 %v3819_v6  ;;  %1680 = vmatprep.subr.bf16.mxu0 %v3824_v63  ;;  %v3911_v6 = vld [vmem:[#allocation5 + $0x44] ss:$16 sps:$4 sm:$0xff]   ;;  %v3909_v63 = vld [vmem:[#allocation5 + $0x40] ss:$16 sps:$4 sm:$0xff]  }
  0xcc   :  { %1705 = vmatprep.subr.bf16.mxu1 %v3827_v0  ;;  %v3978_v0 = vld [vmem:[#allocation5 + $0x2a0] ss:$16 sps:$4 sm:$0xff]  }
  0xce   :  { %1681 = vmatpush2.bf16.msra.mxu0 %v3822_v1  ;;  %v3980_v1 = vld [vmem:[#allocation5 + $0x2a4] ss:$16 sps:$4 sm:$0xff]  }
  0xcf   :  { %1706 = vmatpush1.bf16.msra.mxu1 %v3825_v2  ;;  %1682 = vmatprep.subr.bf16.mxu0 %v3830_v3  ;;  %v3914_v2 = vld [vmem:[#allocation5 + $0x24] ss:$16 sps:$4 sm:$0xff]   ;;  %v3912_v3 = vld [vmem:[#allocation5 + $0x20] ss:$16 sps:$4 sm:$0xff]  }
  0xd0   :  { %1707 = vmatprep.subr.bf16.mxu1 %v3833_v4  ;;  %v3984_v4 = vld [vmem:[#allocation5 + $0x280] ss:$16 sps:$4 sm:$0xff]  }
  0xd2   :  { %1683 = vmatpush2.bf16.msra.mxu0 %v3828_v35  ;;  %v3986_v35 = vld [vmem:[#allocation5 + $0x284] ss:$16 sps:$4 sm:$0xff]  }
  0xd3   :  { %1708 = vmatpush1.bf16.msra.mxu1 %v3831_v5  ;;  %1684 = vmatprep.subr.bf16.mxu0 %v3836_v8  ;;  %v3917_v5 = vld [vmem:[#allocation5 + $0x4] ss:$16 sps:$4 sm:$0xff]   ;;  %v3915_v8 = vld [vmem:[#allocation5] ss:$16 sps:$4 sm:$0xff]  }
  0xd4   :  { %1709 = vmatprep.subr.bf16.mxu1 %v3839_v9  ;;  %v3990_v9 = vld [vmem:[#allocation5 + $0x260] ss:$16 sps:$4 sm:$0xff]  }
  0xd6   :  { %1685 = vmatpush2.bf16.msra.mxu0 %v3834_v10  ;;  %v3992_v10 = vld [vmem:[#allocation5 + $0x264] ss:$16 sps:$4 sm:$0xff]  }
  0xd7   :  { %1710 = vmatpush1.bf16.msra.mxu1 %v3837_v11  ;;  %1686 = vmatprep.subr.bf16.mxu0 %v3842_v12  ;;  %v3920_v11 = vld [vmem:[#allocation5 + $0x1e4] ss:$16 sps:$4 sm:$0xff]   ;;  %v3918_v12 = vld [vmem:[#allocation5 + $0x1e0] ss:$16 sps:$4 sm:$0xff]  }
  0xd8   :  { %1711 = vmatprep.subr.bf16.mxu1 %v3845_v13  ;;  %v3996_v13 = vld [vmem:[#allocation5 + $0x240] ss:$16 sps:$4 sm:$0xff]  }
  0xda   :  { %1687 = vmatpush2.bf16.msra.mxu0 %v3840_v14  ;;  %v3998_v14 = vld [vmem:[#allocation5 + $0x244] ss:$16 sps:$4 sm:$0xff]  }
  0xdb   :  { %1712 = vmatpush1.bf16.msra.mxu1 %v3843_v17  ;;  %1738 = vmatprep.subr.bf16.mxu0 %v3851_v19  ;;  %v3923_v17 = vld [vmem:[#allocation5 + $0x1c4] ss:$16 sps:$4 sm:$0xff]  }
  0xdc   :  { %1713 = vmatprep.subr.bf16.mxu1 %v3848_v18 }
  0xdd   :  { %1689 = vmatmul.mubr.bf16.vlgmr.msra.gmra.mxu0 %v4251_v7  ;;  %v3872_v7 = vld [vmem:[#allocation2 + $0x56c] ss:$16 sps:$4 sm:$0xff]  }
  0xde   :  { %1739 = vmatpush1.bf16.msra.mxu0 %v3849_v21  ;;  %1770 = vmatprep.mubr.bf16.mxu0 %v4189_v16  ;;  %v3881_v16 = vld [vmem:[#allocation2 + $0x64c] ss:$16 sps:$4 sm:$0xff]  }
  0xdf   :  { %1714 = vmatpush2.bf16.msra.mxu1 %v3846_v20  ;;  %1740 = vmatprep.subr.bf16.mxu0 %v3857_v23  ;;  %v3921_v20 = vld [vmem:[#allocation5 + $0x1c0] ss:$16 sps:$4 sm:$0xff]   ;;  %v3926_v23 = vld [vmem:[#allocation5 + $0x1a4] ss:$16 sps:$4 sm:$0xff]  }
  0xe0   :  { %1715 = vmatprep.subr.bf16.mxu1 %v3854_v22 }
  0xe2   :  { %1741 = vmatpush1.bf16.msra.mxu0 %v3855_v25  ;;  %v4002_v25 = vld [vmem:[#allocation5 + $0x220] ss:$16 sps:$4 sm:$0xff]  }
  0xe3   :  { %1716 = vmatpush2.bf16.msra.mxu1 %v3852_v24  ;;  %1742 = vmatprep.subr.bf16.mxu0 %v3863_v27  ;;  %v4004_v24 = vld [vmem:[#allocation5 + $0x224] ss:$16 sps:$4 sm:$0xff]  }
  0xe4   :  { %1717 = vmatprep.subr.bf16.mxu1 %v3860_v26 }
  0xe6   :  { %1743 = vmatpush1.bf16.msra.mxu0 %v3861_v29 }
  0xe7   :  { %1718 = vmatpush2.bf16.msra.mxu1 %v3858_v28  ;;  %1744 = vmatprep.subr.bf16.mxu0 %v3869_v31  ;;  %v3924_v28 = vld [vmem:[#allocation5 + $0x1a0] ss:$16 sps:$4 sm:$0xff]   ;;  %v3929_v31 = vld [vmem:[#allocation5 + $0x184] ss:$16 sps:$4 sm:$0xff]  }
  0xe8   :  { %1719 = vmatprep.subr.bf16.mxu1 %v3866_v30 }
  0xea   :  { %1745 = vmatpush1.bf16.msra.mxu0 %v3867_v33  ;;  %v4010_v33 = vld [vmem:[#allocation5 + $0x204] ss:$16 sps:$4 sm:$0xff]  }
  0xeb   :  { %1720 = vmatpush2.bf16.msra.mxu1 %v3864_v32  ;;  %1746 = vmatprep.subr.bf16.mxu0 %v3875_v51  ;;  %v4008_v32 = vld [vmem:[#allocation5 + $0x200] ss:$16 sps:$4 sm:$0xff]  }
  0xec   :  { %1721 = vmatprep.subr.bf16.mxu1 %v3872_v7  ;;  %v3927_v7 = vld [vmem:[#allocation5 + $0x180] ss:$16 sps:$4 sm:$0xff]  }
  0xed   :  { %v4014_v51 = vld [vmem:[#allocation5 + $0x3e0] ss:$16 sps:$4 sm:$0xff]  }
  0xee   :  { %1747 = vmatpush1.bf16.msra.mxu0 %v3873_v36  ;;  %v3932_v36 = vld [vmem:[#allocation5 + $0x164] ss:$16 sps:$4 sm:$0xff]  }
  0xef   :  { %1722 = vmatpush2.bf16.msra.mxu1 %v3870_v34  ;;  %1748 = vmatprep.subr.bf16.mxu0 %v3881_v16  ;;  %v4016_v34 = vld [vmem:[#allocation5 + $0x3e4] ss:$16 sps:$4 sm:$0xff]   ;;  %v3930_v16 = vld [vmem:[#allocation5 + $0x160] ss:$16 sps:$4 sm:$0xff]  }
  0xf0   :  { %1723 = vmatprep.subr.bf16.mxu1 %v3878_v37  ;;  %v4019_v37 = vld [vmem:[#allocation5 + $0x3c4] ss:$16 sps:$4 sm:$0xff]  }
  0xf2   :  { %1749 = vmatpush1.bf16.msra.mxu0 %v3879_v39  ;;  %v3935_v39 = vld [vmem:[#allocation5 + $0x144] ss:$16 sps:$4 sm:$0xff]  }
  0xf3   :  { %1724 = vmatpush2.bf16.msra.mxu1 %v3876_v38  ;;  %1750 = vmatprep.subr.bf16.mxu0 %v3887_v41  ;;  %v4017_v38 = vld [vmem:[#allocation5 + $0x3c0] ss:$16 sps:$4 sm:$0xff]  }
  0xf4   :  { %1725 = vmatprep.subr.bf16.mxu1 %v3884_v40  ;;  %v4022_v40 = vld [vmem:[#allocation5 + $0x3a4] ss:$16 sps:$4 sm:$0xff]   ;;  %v3933_v41 = vld [vmem:[#allocation5 + $0x140] ss:$16 sps:$4 sm:$0xff]  }
  0xf6   :  { %1751 = vmatpush1.bf16.msra.mxu0 %v3885_v43  ;;  %v3938_v43 = vld [vmem:[#allocation5 + $0x124] ss:$16 sps:$4 sm:$0xff]  }
  0xf7   :  { %1726 = vmatpush2.bf16.msra.mxu1 %v3882_v42  ;;  %1752 = vmatprep.subr.bf16.mxu0 %v3893_v45  ;;  %v4020_v42 = vld [vmem:[#allocation5 + $0x3a0] ss:$16 sps:$4 sm:$0xff]  }
  0xf8   :  { %1727 = vmatprep.subr.bf16.mxu1 %v3890_v44  ;;  %v4025_v44 = vld [vmem:[#allocation5 + $0x384] ss:$16 sps:$4 sm:$0xff]   ;;  %v3936_v45 = vld [vmem:[#allocation5 + $0x120] ss:$16 sps:$4 sm:$0xff]  }
  0xfa   :  { %1753 = vmatpush1.bf16.msra.mxu0 %v3891_v48  ;;  %v3941_v48 = vld [vmem:[#allocation5 + $0x104] ss:$16 sps:$4 sm:$0xff]  }
  0xfb   :  { %1728 = vmatpush2.bf16.msra.mxu1 %v3888_v46  ;;  %2577 = vmatprep.subr.bf16.mxu0 %v3896_v49  ;;  %v4023_v46 = vld [vmem:[#allocation5 + $0x380] ss:$16 sps:$4 sm:$0xff]   ;;  %v4028_v49 = vld [vmem:[#allocation5 + $0x364] ss:$16 sps:$4 sm:$0xff]  }
  0xfc   :  { %2618 = vmatprep.subr.bf16.mxu1 %v3968_v60 }
  0xfd   :  { %1771 = vmatmul.mubr.bf16.vlgmr.msra.gmra.mxu0 %v4118_v53  ;;  %v3944_v53 = vld [vmem:[#allocation5 + $0xec] ss:$16 sps:$4 sm:$0xff]  }
  0xfe   :  { %1730 = vmatmul.mubr.bf16.vlgmr.msra.gmra.mxu1 %v4272_v15  ;;  %2578 = vmatpush1.bf16.msra.mxu0 %v3894_v50  ;;  %v3906_v15 = vld [vmem:[#allocation5 + $0x60] ss:$16 sps:$4 sm:$0xff]  }
  0xff   :  { %2579 = vmatprep.subr.bf16.mxu0 %v3899_v52  ;;  %2619 = vmatpush1.bf16.msra.mxu1 %v3966_v59  ;;  %v3939_v50 = vld [vmem:[#allocation5 + $0x100] ss:$16 sps:$4 sm:$0xff]  }
 0x100   :  { %2620 = vmatprep.subr.bf16.mxu1 %v3974_v47  ;;  %v4026_v52 = vld [vmem:[#allocation5 + $0x360] ss:$16 sps:$4 sm:$0xff]   ;;  %v4040_v47 = vld [vmem:[#allocation5 + $0x2ec] ss:$16 sps:$4 sm:$0xff]  }
 0x101   :  { %v4032_v59 = vld [vmem:[#allocation5 + $0x320] ss:$16 sps:$4 sm:$0xff]  }
 0x102   :  { %2580 = vmatpush1.bf16.msra.mxu0 %v3897_v54  ;;  %v4031_v54 = vld [vmem:[#allocation5 + $0x344] ss:$16 sps:$4 sm:$0xff]  }
 0x103   :  { %2581 = vmatprep.subr.bf16.mxu0 %v3902_v55  ;;  %2621 = vmatpush1.bf16.msra.mxu1 %v3972_v62  ;;  %v4029_v55 = vld [vmem:[#allocation5 + $0x340] ss:$16 sps:$4 sm:$0xff]  }
 0x104   :  { %2622 = vmatprep.subr.bf16.mxu1 %v3980_v1  ;;  %v4035_v62 = vld [vmem:[#allocation5 + $0x300] ss:$16 sps:$4 sm:$0xff]  }
 0x105   :  { %v4298_v1 = vld [vmem:[%s4442_s2] sm:$0xf] }
 0x106   :  { %2582 = vmatpush1.bf16.msra.mxu0 %v3900_v56 }
 0x107   :  { %2583 = vmatprep.subr.bf16.mxu0 %v3905_v57  ;;  %2623 = vmatpush1.bf16.msra.mxu1 %v3978_v0 }
 0x108   :  { %2624 = vmatprep.subr.bf16.mxu1 %v3986_v35 }
 0x10a   :  { %2584 = vmatpush1.bf16.msra.mxu0 %v3903_v58  ;;  %v4034_v58 = vld [vmem:[#allocation5 + $0x324] ss:$16 sps:$4 sm:$0xff]  }
 0x10b   :  { %2585 = vmatprep.subr.bf16.mxu0 %v3908_v61  ;;  %2625 = vmatpush1.bf16.msra.mxu1 %v3984_v4 }
 0x10c   :  { %2626 = vmatprep.subr.bf16.mxu1 %v3992_v10 }
 0x10e   :  { %2586 = vmatpush1.bf16.msra.mxu0 %v3906_v15  ;;  %v4037_v15 = vld [vmem:[#allocation5 + $0x304] ss:$16 sps:$4 sm:$0xff]  }
 0x10f   :  { %2587 = vmatprep.subr.bf16.mxu0 %v3911_v6  ;;  %2627 = vmatpush1.bf16.msra.mxu1 %v3990_v9  ;;  %v286_v6 = vlaneseq }
 0x110   :  { %2628 = vmatprep.subr.bf16.mxu1 %v3998_v14 }
 0x112   :  { %2588 = vmatpush1.bf16.msra.mxu0 %v3909_v63  ;;  %v4292_v63 = vshrl.u32 %v286_v6, 7 }
 0x113   :  { %2589 = vmatprep.subr.bf16.mxu0 %v3914_v2  ;;  %2629 = vmatpush1.bf16.msra.mxu1 %v3996_v13 }
 0x114   :  { %2630 = vmatprep.subr.bf16.mxu1 %v4004_v24  ;;  %v288_v0 = vsub.s32 0, %v4292_v63  ;;  %v292_v2 = vsub.s32 1, %v4292_v63 }
 0x116   :  { %2590 = vmatpush1.bf16.msra.mxu0 %v3912_v3  ;;  %v289_v3 = vrot.slane %v4298_v1, %v288_v0  ;;  %v293_v4 = vrot.slane %v4298_v1, %v292_v2 }
 0x117   :  { %2591 = vmatprep.subr.bf16.mxu0 %v3917_v5  ;;  %2631 = vmatpush1.bf16.msra.mxu1 %v4002_v25 }
 0x118   :  { %2632 = vmatprep.subr.bf16.mxu1 %v4010_v33  ;;  %v3959_v33 = vld [vmem:[#allocation5 + $0x4c] ss:$16 sps:$4 sm:$0xff]  }
 0x11a   :  { %2592 = vmatpush1.bf16.msra.mxu0 %v3915_v8 }
 0x11b   :  { %2593 = vmatprep.subr.bf16.mxu0 %v3920_v11  ;;  %2633 = vmatpush1.bf16.msra.mxu1 %v4008_v32  ;;  %v3954_v32 = vld [vmem:[#allocation5 + $0x68] ss:$16 sps:$4 sm:$0xff]  }
 0x11c   :  { %2634 = vmatprep.subr.bf16.mxu1 %v4016_v34 }
 0x11d   :  { %v4284_v18 = vpop.f32.mrf.mxu0 }
 0x11e   :  { %v4286_v19 = vpop.f32.mrf.mxu1  ;;  %2594 = vmatpush2.bf16.msra.mxu0 %v3918_v12  ;;  %v1486_v35 = vadd.f32 %v4284_v18, %v289_v3  ;;  %v3947_v18 = vld [vmem:[#allocation5 + $0xcc] ss:$16 sps:$4 sm:$0xff]  }
 0x11f   :  { %v4288_v21 = vpop.f32.mrf.mxu0  ;;  %2595 = vmatprep.subr.bf16.mxu0 %v3923_v17  ;;  %2635 = vmatpush2.bf16.msra.mxu1 %v4014_v51  ;;  %v3962_v51 = vld [vmem:[#allocation5 + $0x2c] ss:$16 sps:$4 sm:$0xff]  }
 0x120   :  { %v4290_v22 = vpop.f32.mrf.mxu1  ;;  %2636 = vmatprep.subr.bf16.mxu1 %v4019_v37  ;;  %v1488_v5 = vadd.f32 %v4288_v21, %v293_v4  ;;  %v1527_v8 = vadd.f32 %v4286_v19, %v1486_v35  ;;  %v3945_v19 = vld [vmem:[#allocation5 + $0xc8] ss:$16 sps:$4 sm:$0xff]   ;;  %v3950_v21 = vld [vmem:[#allocation5 + $0xac] ss:$16 sps:$4 sm:$0xff]  }
 0x121   :  { %v1489_v26 = vpop.f32.mrf.mxu0 }
 0x122   :  { %v1530_v27 = vpop.f32.mrf.mxu1  ;;  %2596 = vmatpush2.bf16.msra.mxu0 %v3921_v20  ;;  %v1529_v10 = vadd.f32 %v4290_v22, %v1488_v5  ;;  %v3948_v22 = vld [vmem:[#allocation5 + $0xa8] ss:$16 sps:$4 sm:$0xff]  }
 0x123   :  { %v1490_v29 = vpop.f32.mrf.mxu0  ;;  %2597 = vmatprep.subr.bf16.mxu0 %v3926_v23  ;;  %2637 = vmatpush2.bf16.msra.mxu1 %v4017_v38  ;;  %v3942_v27 = vld [vmem:[#allocation5 + $0xe8] ss:$16 sps:$4 sm:$0xff]  }
 0x124   :  { %v1531_v30 = vpop.f32.mrf.mxu1  ;;  %2638 = vmatprep.subr.bf16.mxu1 %v4022_v40  ;;  %v3953_v29 = vld [vmem:[#allocation5 + $0x8c] ss:$16 sps:$4 sm:$0xff]  }
 0x125   :  { %v3951_v30 = vld [vmem:[#allocation5 + $0x88] ss:$16 sps:$4 sm:$0xff]  }
 0x126   :  { %2598 = vmatpush2.bf16.msra.mxu0 %v3924_v28 }
 0x127   :  { %2599 = vmatprep.subr.bf16.mxu0 %v3929_v31  ;;  %2639 = vmatpush2.bf16.msra.mxu1 %v4020_v42  ;;  %v3956_v31 = vld [vmem:[#allocation5 + $0x6c] ss:$16 sps:$4 sm:$0xff]   ;;  %v3969_v42 = vld [vmem:[#allocation5 + $0x1e8] ss:$16 sps:$4 sm:$0xff]  }
 0x128   :  { %2640 = vmatprep.subr.bf16.mxu1 %v4025_v44  ;;  %v3975_v44 = vld [vmem:[#allocation5 + $0x1c8] ss:$16 sps:$4 sm:$0xff]  }
 0x12a   :  { %2600 = vmatpush2.bf16.msra.mxu0 %v3927_v7  ;;  %v3957_v7 = vld [vmem:[#allocation5 + $0x48] ss:$16 sps:$4 sm:$0xff]  }
 0x12b   :  { %2601 = vmatprep.subr.bf16.mxu0 %v3932_v36  ;;  %2641 = vmatpush2.bf16.msra.mxu1 %v4023_v46  ;;  %v3960_v36 = vld [vmem:[#allocation5 + $0x28] ss:$16 sps:$4 sm:$0xff]  }
 0x12c   :  { %2642 = vmatprep.subr.bf16.mxu1 %v4028_v49  ;;  %v3981_v46 = vld [vmem:[#allocation5 + $0x1a8] ss:$16 sps:$4 sm:$0xff]  }
 0x12d   :  { %v3987_v49 = vld [vmem:[#allocation5 + $0x188] ss:$16 sps:$4 sm:$0xff]  }
 0x12e   :  { %2602 = vmatpush2.bf16.msra.mxu0 %v3930_v16  ;;  %v3965_v16 = vld [vmem:[#allocation5 + $0xc] ss:$16 sps:$4 sm:$0xff]  }
 0x12f   :  { %2603 = vmatprep.subr.bf16.mxu0 %v3935_v39  ;;  %2643 = vmatpush2.bf16.msra.mxu1 %v4026_v52  ;;  %v3963_v39 = vld [vmem:[#allocation5 + $0x8] ss:$16 sps:$4 sm:$0xff]  }
 0x130   :  { %2644 = vmatprep.subr.bf16.mxu1 %v4031_v54  ;;  %v3993_v52 = vld [vmem:[#allocation5 + $0x168] ss:$16 sps:$4 sm:$0xff]  }
 0x131   :  { %v3999_v54 = vld [vmem:[#allocation5 + $0x148] ss:$16 sps:$4 sm:$0xff]  }
 0x132   :  { %2604 = vmatpush2.bf16.msra.mxu0 %v3933_v41  ;;  %v3971_v41 = vld [vmem:[#allocation5 + $0x1ec] ss:$16 sps:$4 sm:$0xff]  }
 0x133   :  { %2605 = vmatprep.subr.bf16.mxu0 %v3938_v43  ;;  %2645 = vmatpush2.bf16.msra.mxu1 %v4029_v55  ;;  %v3977_v43 = vld [vmem:[#allocation5 + $0x1cc] ss:$16 sps:$4 sm:$0xff]  }
 0x134   :  { %2646 = vmatprep.subr.bf16.mxu1 %v4034_v58  ;;  %v4007_v55 = vld [vmem:[#allocation5 + $0x12c] ss:$16 sps:$4 sm:$0xff]  }
 0x136   :  { %2606 = vmatpush2.bf16.msra.mxu0 %v3936_v45  ;;  %v3983_v45 = vld [vmem:[#allocation5 + $0x1ac] ss:$16 sps:$4 sm:$0xff]  }
 0x137   :  { %2607 = vmatprep.subr.bf16.mxu0 %v3941_v48  ;;  %2647 = vmatpush2.bf16.msra.mxu1 %v4032_v59  ;;  %v3989_v48 = vld [vmem:[#allocation5 + $0x18c] ss:$16 sps:$4 sm:$0xff]  }
 0x138   :  { %2648 = vmatprep.subr.bf16.mxu1 %v4037_v15  ;;  %v4013_v59 = vld [vmem:[#allocation5 + $0x10c] ss:$16 sps:$4 sm:$0xff]  }
 0x13a   :  { %2608 = vmatpush2.bf16.msra.mxu0 %v3939_v50  ;;  %v3995_v50 = vld [vmem:[#allocation5 + $0x16c] ss:$16 sps:$4 sm:$0xff]  }
 0x13b   :  { %2659 = vmatprep.subr.bf16.mxu0 %v3944_v53  ;;  %2649 = vmatpush2.bf16.msra.mxu1 %v4035_v62  ;;  %v4001_v53 = vld [vmem:[#allocation5 + $0x14c] ss:$16 sps:$4 sm:$0xff]   ;;  %v296_v62 = vsub.s32 2, %v4292_v63 }
 0x13c   :  { %2700 = vmatprep.subr.bf16.mxu1 %v4040_v47  ;;  %v300_v47 = vsub.s32 3, %v4292_v63 }
 0x13d   :  { %v297_v6 = vrot.slane %v4298_v1, %v296_v62 }
 0x13e   :  { %v1608_v56 = vpop.f32.mrf.mxu1  ;;  %v301_v3 = vrot.slane %v4298_v1, %v300_v47  ;;  %v4038_v1 = vld [vmem:[#allocation5 + $0x2e8] ss:$16 sps:$4 sm:$0xff]  }
 0x140   :  { %v1610_v57 = vpop.f32.mrf.mxu1 }
 0x142   :  { %v1612_v60 = vpop.f32.mrf.mxu1 }
 0x144   :  { %v1613_v61 = vpop.f32.mrf.mxu1 }
 0x145   :  { %v4011_v61 = vld [vmem:[#allocation5 + $0x108] ss:$16 sps:$4 sm:$0xff]  }
 0x15d   :  { %v1567_v9 = vpop.f32.mrf.mxu0 }
 0x15e   :  { %v1568_v11 = vadd.f32 %v1567_v9, %v1527_v8 }
 0x15f   :  { %v1569_v12 = vpop.f32.mrf.mxu0 }
 0x160   :  { %v1609_v13 = vadd.f32 %v1608_v56, %v1568_v11  ;;  %v1570_v14 = vadd.f32 %v1569_v12, %v1529_v10 }
 0x161   :  { %v1571_v17 = vpop.f32.mrf.mxu0 }
 0x162   :  { %v1611_v20 = vadd.f32 %v1610_v57, %v1570_v14  ;;  %v1779_v23 = vmax.f32 %v1609_v13, 0.0  ;;  %v4005_v57 = vld [vmem:[#allocation5 + $0x128] ss:$16 sps:$4 sm:$0xff]  }
 0x163   :  { %v1572_v24 = vpop.f32.mrf.mxu0 }
 0x164   :  { %v1780_v25 = vmax.f32 %v1611_v20, 0.0  ;;  %v4311_v28 = vpack.c.bf16 %v1779_v23, %v1779_v23 }
 0x166   :  { %v1784_v26 = vpack.c.bf16 %v1780_v25, %v1780_v25 }
 0x168   :  { %2609 = vmatprep.mubr.bf16.mxu0 %v1784_v26 }
 0x169   :  { %2610 = vmatmul.mubr.bf16.vlgmr.msra.gmra.mxu0 %v4311_v28 }
 0x16a   :  { %2660 = vmatpush1.bf16.msra.mxu0 %v3942_v27  ;;  %2691 = vmatprep.mubr.bf16.mxu0 %v1784_v26 }
 0x16b   :  { %2661 = vmatprep.subr.bf16.mxu0 %v3947_v18 }
 0x16e   :  { %2662 = vmatpush1.bf16.msra.mxu0 %v3945_v19 }
 0x16f   :  { %2663 = vmatprep.subr.bf16.mxu0 %v3950_v21  ;;  %v4043_v21 = vld [vmem:[#allocation5 + $0x2cc] ss:$16 sps:$4 sm:$0xff]  }
 0x172   :  { %2664 = vmatpush1.bf16.msra.mxu0 %v3948_v22  ;;  %v4041_v22 = vld [vmem:[#allocation5 + $0x2c8] ss:$16 sps:$4 sm:$0xff]  }
 0x173   :  { %2665 = vmatprep.subr.bf16.mxu0 %v3953_v29  ;;  %v4046_v29 = vld [vmem:[#allocation5 + $0x2ac] ss:$16 sps:$4 sm:$0xff]  }
 0x176   :  { %2666 = vmatpush1.bf16.msra.mxu0 %v3951_v30  ;;  %v4044_v30 = vld [vmem:[#allocation5 + $0x2a8] ss:$16 sps:$4 sm:$0xff]  }
 0x177   :  { %2667 = vmatprep.subr.bf16.mxu0 %v3956_v31  ;;  %v4049_v31 = vld [vmem:[#allocation5 + $0x28c] ss:$16 sps:$4 sm:$0xff]  }
 0x17a   :  { %2668 = vmatpush1.bf16.msra.mxu0 %v3954_v32  ;;  %v4047_v32 = vld [vmem:[#allocation5 + $0x288] ss:$16 sps:$4 sm:$0xff]  }
 0x17b   :  { %2669 = vmatprep.subr.bf16.mxu0 %v3959_v33  ;;  %v4052_v33 = vld [vmem:[#allocation5 + $0x26c] ss:$16 sps:$4 sm:$0xff]  }
 0x17e   :  { %v1649_v34 = vpop.f32.mrf.mxu1  ;;  %2670 = vmatpush1.bf16.msra.mxu0 %v3957_v7  ;;  %v4050_v7 = vld [vmem:[#allocation5 + $0x268] ss:$16 sps:$4 sm:$0xff]  }
 0x17f   :  { %2671 = vmatprep.subr.bf16.mxu0 %v3962_v51  ;;  %v1650_v4 = vadd.f32 %v1649_v34, %v297_v6  ;;  %v4055_v51 = vld [vmem:[#allocation5 + $0x24c] ss:$16 sps:$4 sm:$0xff]   ;;  %v4053_v34 = vld [vmem:[#allocation5 + $0x248] ss:$16 sps:$4 sm:$0xff]  }
 0x180   :  { %v1651_v37 = vpop.f32.mrf.mxu1  ;;  %v4080_v6 = vld [vmem:[#allocation5 + $0x328] ss:$16 sps:$4 sm:$0xff]  }
 0x181   :  { %v1652_v35 = vadd.f32 %v1651_v37, %v301_v3  ;;  %v4056_v37 = vld [vmem:[#allocation5 + $0x228] ss:$16 sps:$4 sm:$0xff]  }
 0x182   :  { %v1653_v38 = vpop.f32.mrf.mxu1  ;;  %2672 = vmatpush1.bf16.msra.mxu0 %v3960_v36  ;;  %v4058_v36 = vld [vmem:[#allocation5 + $0x22c] ss:$16 sps:$4 sm:$0xff]  }
 0x183   :  { %2673 = vmatprep.subr.bf16.mxu0 %v3965_v16  ;;  %v4061_v16 = vld [vmem:[#allocation5 + $0x20c] ss:$16 sps:$4 sm:$0xff]   ;;  %v4059_v38 = vld [vmem:[#allocation5 + $0x208] ss:$16 sps:$4 sm:$0xff]  }
 0x184   :  { %v1654_v40 = vpop.f32.mrf.mxu1  ;;  %v4095_v3 = vld [vmem:[%s4445_s5 + $0x18] sm:$0xff]  }
 0x185   :  { %v4062_v40 = vld [vmem:[#allocation5 + $0x3e8] ss:$16 sps:$4 sm:$0xff]  }
 0x186   :  { %2674 = vmatpush1.bf16.msra.mxu0 %v3963_v39  ;;  %v4064_v39 = vld [vmem:[#allocation5 + $0x3ec] ss:$16 sps:$4 sm:$0xff]  }
 0x187   :  { %2675 = vmatprep.subr.bf16.mxu0 %v3971_v41  ;;  %v4067_v41 = vld [vmem:[#allocation5 + $0x3cc] ss:$16 sps:$4 sm:$0xff]  }
 0x18a   :  { %2676 = vmatpush2.bf16.msra.mxu0 %v3969_v42  ;;  %v4065_v42 = vld [vmem:[#allocation5 + $0x3c8] ss:$16 sps:$4 sm:$0xff]  }
 0x18b   :  { %2677 = vmatprep.subr.bf16.mxu0 %v3977_v43  ;;  %v4070_v43 = vld [vmem:[#allocation5 + $0x3ac] ss:$16 sps:$4 sm:$0xff]  }
 0x18e   :  { %2678 = vmatpush2.bf16.msra.mxu0 %v3975_v44  ;;  %v4068_v44 = vld [vmem:[#allocation5 + $0x3a8] ss:$16 sps:$4 sm:$0xff]  }
 0x18f   :  { %2679 = vmatprep.subr.bf16.mxu0 %v3983_v45  ;;  %v4073_v45 = vld [vmem:[#allocation5 + $0x38c] ss:$16 sps:$4 sm:$0xff]  }
 0x192   :  { %2680 = vmatpush2.bf16.msra.mxu0 %v3981_v46  ;;  %v4086_v46 = vld [vmem:[%s4445_s5 + $0x78] sm:$0xff]  }
 0x193   :  { %2681 = vmatprep.subr.bf16.mxu0 %v3989_v48  ;;  %v4087_v48 = vld [vmem:[%s4445_s5 + $0x38] sm:$0xff]  }
 0x196   :  { %2682 = vmatpush2.bf16.msra.mxu0 %v3987_v49  ;;  %v4088_v49 = vld [vmem:[%s4445_s5 + $0x70] sm:$0xff]  }
 0x197   :  { %2683 = vmatprep.subr.bf16.mxu0 %v3995_v50  ;;  %v4071_v50 = vld [vmem:[#allocation5 + $0x388] ss:$16 sps:$4 sm:$0xff]  }
 0x19a   :  { %2684 = vmatpush2.bf16.msra.mxu0 %v3993_v52  ;;  %v4089_v52 = vld [vmem:[%s4445_s5 + $0x30] sm:$0xff]  }
 0x19b   :  { %2685 = vmatprep.subr.bf16.mxu0 %v4001_v53  ;;  %v4076_v53 = vld [vmem:[#allocation5 + $0x36c] ss:$16 sps:$4 sm:$0xff]  }
 0x19d   :  { %v1690_v56 = vpop.f32.mrf.mxu0 }
 0x19e   :  { %2686 = vmatpush2.bf16.msra.mxu0 %v3999_v54  ;;  %v1691_v5 = vadd.f32 %v1690_v56, %v1650_v4  ;;  %v4090_v54 = vld [vmem:[%s4445_s5 + $0x68] sm:$0xff]  }
 0x19f   :  { %v1692_v58 = vpop.f32.mrf.mxu0  ;;  %2687 = vmatprep.subr.bf16.mxu0 %v4007_v55  ;;  %v4074_v55 = vld [vmem:[#allocation5 + $0x368] ss:$16 sps:$4 sm:$0xff]   ;;  %v4085_v4 = vld [vmem:[#allocation5 + $0x30c] ss:$16 sps:$4 sm:$0xff]  }
 0x1a0   :  { %v1693_v10 = vadd.f32 %v1692_v58, %v1652_v35  ;;  %v4091_v56 = vld [vmem:[%s4445_s5 + $0x28] sm:$0xff]   ;;  %v4092_v58 = vld [vmem:[%s4445_s5 + $0x60] sm:$0xff]   ;;  %v4096_v35 = vld [vmem:[%s4445_s5 + $0x50] sm:$0xff]  }
 0x1a1   :  { %v1694_v60 = vpop.f32.mrf.mxu0 }
 0x1a2   :  { %2688 = vmatpush2.bf16.msra.mxu0 %v4005_v57  ;;  %v4079_v57 = vld [vmem:[#allocation5 + $0x34c] ss:$16 sps:$4 sm:$0xff]   ;;  %v4093_v60 = vld [vmem:[%s4445_s5 + $0x20] sm:$0xff]  }
 0x1a3   :  { %v1695_v15 = vpop.f32.mrf.mxu0  ;;  %2689 = vmatprep.subr.bf16.mxu0 %v4013_v59  ;;  %v4077_v59 = vld [vmem:[#allocation5 + $0x348] ss:$16 sps:$4 sm:$0xff]  }
 0x1a4   :  { %v4094_v15 = vld [vmem:[%s4445_s5 + $0x58] sm:$0xff]  }
 0x1a6   :  { %2690 = vmatpush2.bf16.msra.mxu0 %v4011_v61  ;;  %v4082_v61 = vld [vmem:[#allocation5 + $0x32c] ss:$16 sps:$4 sm:$0xff]  }
 0x1a7   :  { %3501 = vmatprep.subr.bf16.mxu0 %v4086_v46 }
 0x1a9   :  { %2692 = vmatmul.mubr.bf16.vlgmr.msra.gmra.mxu0 %v4311_v28 }
 0x1aa   :  { %3502 = vmatpush3.bf16.msra.mxu0 %v4087_v48 }
 0x1ab   :  { %3503 = vmatprep.subr.bf16.mxu0 %v4088_v49 }
 0x1ae   :  { %3504 = vmatpush3.bf16.msra.mxu0 %v4089_v52 }
 0x1af   :  { %3505 = vmatprep.subr.bf16.mxu0 %v4090_v54 }
 0x1b2   :  { %3506 = vmatpush3.bf16.msra.mxu0 %v4091_v56 }
 0x1b3   :  { %3507 = vmatprep.subr.bf16.mxu0 %v4092_v58 }
 0x1b6   :  { %3508 = vmatpush3.bf16.msra.mxu0 %v4093_v60 }
 0x1b7   :  { %3509 = vmatprep.subr.bf16.mxu0 %v4094_v15 }
 0x1ba   :  { %3510 = vmatpush3.bf16.msra.mxu0 %v4095_v3 }
 0x1bb   :  { %3511 = vmatprep.subr.bf16.mxu0 %v4096_v35 }
 0x1bd   :  { %v1772_v9 = vpop.f32.mrf.mxu0 }
 0x1be   :  { %v1731_v8 = vpop.f32.mrf.mxu1 }
 0x1bf   :  { %v1732_v11 = vadd.f32 %v1731_v8, %v1691_v5  ;;  %v1774_v13 = vpop.f32.mrf.mxu0  ;;  %v4083_v5 = vld [vmem:[#allocation5 + $0x308] ss:$16 sps:$4 sm:$0xff]   ;;  %v4097_v8 = vld [vmem:[%s4445_s5 + $0x10] sm:$0xff]  }
 0x1c0   :  { %v1733_v12 = vpop.f32.mrf.mxu1  ;;  %3512 = vmatpush3.bf16.msra.mxu0 %v4097_v8 }
 0x1c1   :  { %v1773_v14 = vadd.f32 %v1772_v9, %v1732_v11  ;;  %v1734_v17 = vadd.f32 %v1733_v12, %v1693_v10  ;;  %v1776_v23 = vpop.f32.mrf.mxu0  ;;  %v4098_v9 = vld [vmem:[%s4445_s5 + $0x48] sm:$0xff]   ;;  %v4100_v11 = vld [vmem:[%s4445_s5 + $0x40] sm:$0xff]  }
 0x1c2   :  { %v1735_v20 = vpop.f32.mrf.mxu1  ;;  %v4099_v10 = vld [vmem:[%s4445_s5 + $0x8] sm:$0xff]   ;;  %3513 = vmatprep.subr.bf16.mxu0 %v4098_v9  ;;  %v4101_v12 = vld [vmem:[%s4445_s5] sm:$0xff]  }
 0x1c3   :  { %v1775_v24 = vadd.f32 %v1774_v13, %v1734_v17  ;;  %v1781_v25 = vmax.f32 %v1773_v14, 0.0  ;;  %v1777_v27 = vpop.f32.mrf.mxu0  ;;  %v4102_v13 = vld [vmem:[%s4445_s5 + $0xf8] sm:$0xff]   ;;  %v4104_v17 = vld [vmem:[%s4445_s5 + $0xf0] sm:$0xff]   ;;  %v4106_v23 = vld [vmem:[%s4445_s5 + $0xe8] sm:$0xff]  }
 0x1c4   :  { %v1736_v26 = vpop.f32.mrf.mxu1  ;;  %3514 = vmatpush3.bf16.msra.mxu0 %v4099_v10  ;;  %v4103_v14 = vld [vmem:[%s4445_s5 + $0xb8] sm:$0xff]   ;;  %v4105_v20 = vld [vmem:[%s4445_s5 + $0xb0] sm:$0xff]  }
 0x1c5   :  { %v1782_v28 = vmax.f32 %v1775_v24, 0.0  ;;  %v4323_v19 = vpack.c.bf16 %v1781_v25, %v1781_v25  ;;  %3515 = vmatprep.subr.bf16.mxu0 %v4100_v11  ;;  %v4107_v24 = vld [vmem:[%s4445_s5 + $0xa8] sm:$0xff]   ;;  %v4108_v25 = vld [vmem:[%s4445_s5 + $0xe0] sm:$0xff]   ;;  %v4110_v27 = vld [vmem:[%s4445_s5 + $0xd8] sm:$0xff]  }
 0x1c6   :  { %v4109_v26 = vld [vmem:[%s4445_s5 + $0xa0] sm:$0xff]  }
 0x1c7   :  { %v1786_v18 = vpack.c.bf16 %v1782_v28, %v1782_v28  ;;  %v4111_v28 = vld [vmem:[%s4445_s5 + $0x98] sm:$0xff]  }
 0x1c8   :  { %3516 = vmatpush3.bf16.msra.mxu0 %v4101_v12 }
 0x1c9   :  { %2650 = vmatprep.mubr.bf16.mxu1 %v1786_v18 }
 0x1ca   :  { %2651 = vmatmul.mubr.bf16.vlgmr.msra.gmra.mxu1 %v4323_v19 }
 0x1cb   :  { %2701 = vmatpush1.bf16.msra.mxu1 %v4038_v1  ;;  %2732 = vmatprep.mubr.bf16.mxu1 %v1786_v18  ;;  %v4112_v18 = vld [vmem:[%s4445_s5 + $0xd0] sm:$0xff]  }
 0x1cc   :  { %2702 = vmatprep.subr.bf16.mxu1 %v4043_v21  ;;  %v4113_v1 = vld [vmem:[%s4445_s5 + $0x90] sm:$0xff]  }
 0x1cf   :  { %2703 = vmatpush1.bf16.msra.mxu1 %v4041_v22 }
 0x1d0   :  { %2704 = vmatprep.subr.bf16.mxu1 %v4046_v29 }
 0x1d3   :  { %2705 = vmatpush1.bf16.msra.mxu1 %v4044_v30  ;;  %v4114_v30 = vld [vmem:[%s4445_s5 + $0xc8] sm:$0xff]  }
 0x1d4   :  { %2706 = vmatprep.subr.bf16.mxu1 %v4049_v31  ;;  %v4115_v31 = vld [vmem:[%s4445_s5 + $0x88] sm:$0xff]  }
 0x1d7   :  { %2707 = vmatpush1.bf16.msra.mxu1 %v4047_v32  ;;  %v4116_v32 = vld [vmem:[%s4445_s5 + $0xc0] sm:$0xff]  }
 0x1d8   :  { %2708 = vmatprep.subr.bf16.mxu1 %v4052_v33  ;;  %v4117_v33 = vld [vmem:[%s4445_s5 + $0x80] sm:$0xff]  }
 0x1db   :  { %2709 = vmatpush1.bf16.msra.mxu1 %v4050_v7 }
 0x1dc   :  { %2710 = vmatprep.subr.bf16.mxu1 %v4055_v51 }
 0x1df   :  { %2711 = vmatpush1.bf16.msra.mxu1 %v4053_v34 }
 0x1e0   :  { %2712 = vmatprep.subr.bf16.mxu1 %v4058_v36 }
 0x1e3   :  { %2713 = vmatpush1.bf16.msra.mxu1 %v4056_v37  ;;  %v1915_v37 = vld [vmem:[%s4444_s4] sm:$0xf] }
 0x1e4   :  { %2714 = vmatprep.subr.bf16.mxu1 %v4061_v16  ;;  %v1920_v16 = vrot.slane %v1915_v37, %v288_v0  ;;  %v1928_v0 = vrot.slane %v1915_v37, %v296_v62 }
 0x1e7   :  { %2715 = vmatpush1.bf16.msra.mxu1 %v4059_v38  ;;  %v1924_v38 = vrot.slane %v1915_v37, %v292_v2  ;;  %v1932_v2 = vrot.slane %v1915_v37, %v300_v47  ;;  %v3468_v47 = vld [vmem:[%s4446_s6] ss:$0 sm:$0xff] }
 0x1e8   :  { %2716 = vmatprep.subr.bf16.mxu1 %v4064_v39 }
 0x1eb   :  { %2717 = vmatpush2.bf16.msra.mxu1 %v4062_v40 }
 0x1ec   :  { %2718 = vmatprep.subr.bf16.mxu1 %v4067_v41 }
 0x1ef   :  { %2719 = vmatpush2.bf16.msra.mxu1 %v4065_v42 }
 0x1f0   :  { %2720 = vmatprep.subr.bf16.mxu1 %v4070_v43 }
 0x1f3   :  { %2721 = vmatpush2.bf16.msra.mxu1 %v4068_v44 }
 0x1f4   :  { %2722 = vmatprep.subr.bf16.mxu1 %v4073_v45 }
 0x1f7   :  { %2723 = vmatpush2.bf16.msra.mxu1 %v4071_v50 }
 0x1f8   :  { %2724 = vmatprep.subr.bf16.mxu1 %v4076_v53 }
 0x1fb   :  { %2725 = vmatpush2.bf16.msra.mxu1 %v4074_v55 }
 0x1fc   :  { %2726 = vmatprep.subr.bf16.mxu1 %v4079_v57 }
 0x1ff   :  { %2727 = vmatpush2.bf16.msra.mxu1 %v4077_v59 }
 0x200   :  { %2728 = vmatprep.subr.bf16.mxu1 %v4082_v61 }
 0x203   :  { %2729 = vmatpush2.bf16.msra.mxu1 %v4080_v6 }
 0x204   :  { %2730 = vmatprep.subr.bf16.mxu1 %v4085_v4 }
 0x207   :  { %2731 = vmatpush2.bf16.msra.mxu1 %v4083_v5 }
 0x208   :  { %3523 = vmatprep.subr.bf16.mxu1 %v4102_v13 }
 0x20a   :  { %2733 = vmatmul.mubr.bf16.vlgmr.msra.gmra.mxu1 %v4323_v19 }
 0x20b   :  { %3524 = vmatpush3.bf16.msra.mxu1 %v4103_v14 }
 0x20c   :  { %3525 = vmatprep.subr.bf16.mxu1 %v4104_v17 }
 0x20f   :  { %3526 = vmatpush3.bf16.msra.mxu1 %v4105_v20 }
 0x210   :  { %3527 = vmatprep.subr.bf16.mxu1 %v4106_v23 }
 0x213   :  { %3528 = vmatpush3.bf16.msra.mxu1 %v4107_v24 }
 0x214   :  { %3529 = vmatprep.subr.bf16.mxu1 %v4108_v25 }
 0x217   :  { %3530 = vmatpush3.bf16.msra.mxu1 %v4109_v26 }
 0x218   :  { %3531 = vmatprep.subr.bf16.mxu1 %v4110_v27 }
 0x21b   :  { %3532 = vmatpush3.bf16.msra.mxu1 %v4111_v28 }
 0x21c   :  { %3533 = vmatprep.subr.bf16.mxu1 %v4112_v18 }
 0x21f   :  { %3534 = vmatpush3.bf16.msra.mxu1 %v4113_v1 }
 0x220   :  { %3535 = vmatprep.subr.bf16.mxu1 %v4114_v30 }
 0x223   :  { %3536 = vmatpush3.bf16.msra.mxu1 %v4115_v31 }
 0x224   :  { %3537 = vmatprep.subr.bf16.mxu1 %v4116_v32 }
 0x227   :  { %3538 = vmatpush3.bf16.msra.mxu1 %v4117_v33 }
 0x229   :  { %v2611_v19 = vpop.f32.mrf.mxu0 }
 0x22a   :  { %v2612_v39 = vadd.f32 %v2611_v19, %v1920_v16 }
 0x22b   :  { %v2613_v21 = vpop.f32.mrf.mxu0 }
 0x22c   :  { %v2614_v41 = vadd.f32 %v2613_v21, %v1924_v38 }
 0x22d   :  { %v2615_v22 = vpop.f32.mrf.mxu0 }
 0x22f   :  { %v2616_v29 = vpop.f32.mrf.mxu0 }
 0x269   :  { %v2693_v7 = vpop.f32.mrf.mxu0 }
 0x26a   :  { %v2694_v53 = vadd.f32 %v2693_v7, %v1928_v0 }
 0x26b   :  { %v2695_v51 = vpop.f32.mrf.mxu0 }
 0x26c   :  { %v2696_v55 = vadd.f32 %v2695_v51, %v1932_v2 }
 0x26d   :  { %v2697_v34 = vpop.f32.mrf.mxu0 }
 0x26f   :  { %v2698_v36 = vpop.f32.mrf.mxu0 }
 0x28a   :  { %v2652_v40 = vpop.f32.mrf.mxu1 }
 0x28b   :  { %v2653_v42 = vadd.f32 %v2652_v40, %v2612_v39 }
 0x28c   :  { %v2654_v43 = vpop.f32.mrf.mxu1 }
 0x28d   :  { %v2655_v44 = vadd.f32 %v2654_v43, %v2614_v41  ;;  %v2741_v45 = vmax.f32 %v2653_v42, 0.0 }
 0x28e   :  { %v2656_v46 = vpop.f32.mrf.mxu1 }
 0x28f   :  { %v2742_v48 = vmax.f32 %v2655_v44, 0.0  ;;  %v2745_v52 = vpack.c.bf16 %v2741_v45, %v2741_v45 }
 0x290   :  { %v2657_v49 = vpop.f32.mrf.mxu1 }
 0x291   :  { %v2746_v50 = vpack.c.bf16 %v2742_v48, %v2742_v48 }
 0x293   :  { %3044 = vmatprep.mubr.bf16.mxu0 %v2746_v50 }
 0x294   :  { %3045 = vmatmul.mubr.bf16.vlgmr.msra.gmra.mxu0 %v2745_v52 }
 0x2ca   :  { %v2734_v54 = vpop.f32.mrf.mxu1 }
 0x2cb   :  { %v2735_v56 = vadd.f32 %v2734_v54, %v2694_v53 }
 0x2cc   :  { %v2736_v57 = vpop.f32.mrf.mxu1 }
 0x2cd   :  { %v2737_v58 = vadd.f32 %v2736_v57, %v2696_v55  ;;  %v2743_v59 = vmax.f32 %v2735_v56, 0.0 }
 0x2ce   :  { %v2738_v60 = vpop.f32.mrf.mxu1 }
 0x2cf   :  { %v2744_v61 = vmax.f32 %v2737_v58, 0.0  ;;  %v2747_v3 = vpack.c.bf16 %v2743_v59, %v2743_v59 }
 0x2d0   :  { %v2739_v15 = vpop.f32.mrf.mxu1 }
 0x2d1   :  { %v2748_v6 = vpack.c.bf16 %v2744_v61, %v2744_v61 }
 0x2d3   :  { %3084 = vmatprep.mubr.bf16.mxu1 %v2748_v6 }
 0x2d4   :  { %3085 = vmatmul.mubr.bf16.vlgmr.msra.gmra.mxu1 %v2747_v3 }
 0x354   :  { %v3517_v4 = vpop.f32.mrf.mxu0 }
 0x356   :  { %v3518_v35 = vpop.f32.mrf.mxu0 }
 0x357   :  { %v3519_v63 = vadd.f32 %v3518_v35, %v3517_v4 }
 0x358   :  { %v3520_v62 = vpop.f32.mrf.mxu0 }
 0x359   :  { %v3047_v10 = vadd.f32 %v3519_v63, %v3468_v47 }
 0x35a   :  { %v3521_v5 = vpop.f32.mrf.mxu0 }
 0x394   :  { %v3539_v8 = vpop.f32.mrf.mxu1 }
 0x396   :  { %v3540_v9 = vpop.f32.mrf.mxu1 }
 0x397   :  { %v3541_v11 = vadd.f32 %v3540_v9, %v3539_v8 }
 0x398   :  { %v3542_v12 = vpop.f32.mrf.mxu1 }
 0x399   :  { %v3087_v13 = vadd.f32 %v3541_v11, %v3047_v10 }
 0x39a   :  { %v3543_v14 = vpop.f32.mrf.mxu1 }
 0x39b   :  { %3092 = vst [vmem:[#allocation7] sm:$0xff] %v3087_v13 }
 0x39c   :  { %4170 = shalt.err (!%p4167_p0)
}
 0x39d   :  { %3102 = dma.vmem_to_hbm [thread:$0]  %s3100_s11, 128, %s4447_s7, [#allocation4]  }
 0x39e   :  { %4183 = dma.done.wait [#allocation4], 128  }
 0x39f   :  { %4184 = vsyncadd [#allocation4], 4294967168 }
 0x3a0   :  { %3106 = vsyncpa [#allocation3], 1 }
 0x3a1   :  { %3107 = vsyncpa [#allocation6], 1 }
 0x3a2   :  { %3108 = vsyncpa [#allocation4], 1 }

</bundles_post_ra>
